<compile_context>
chip_gen: v5e
topology: v5e:2x2
jax: 0.10.0
libtpu: 0.0.40
codegen_flags: <defaults>
</compile_context>

<pallas_src>
import jax
import jax.numpy as jnp
from jax import lax
from jax.experimental import pallas as pl
from jax.experimental.pallas import tpu as pltpu

# ----------------------------- scaled-down config -----------------------------
BATCH = 2
C_IN = 3
IMG = 16
PATCH = 8
GRID_HW = IMG // PATCH             # 2
NUM_PATCHES = GRID_HW * GRID_HW    # 4
SEQ = NUM_PATCHES + 1              # 5 (cls token + patches)
HIDDEN = 32
NUM_HEADS = 4
HEAD_DIM = HIDDEN // NUM_HEADS     # 8
MLP = 64
NUM_LAYERS = 2
NUM_CLASSES = 10
LN_EPS = 1e-5
PATCH_DIM = C_IN * PATCH * PATCH   # 192
ROWS = BATCH * SEQ                 # 10 packed token rows
OUT_PAD = 128                      # lane-dense logits slab width

_SQRT1_2 = 0.7071067811865476


# ------------------------------ in-kernel helpers ------------------------------
def _recip(x):
    # EUP approximate reciprocal + one Newton step: err ~ 2^-24 (EUP slot is idle;
    # avoids the multi-cycle VALU f32 divide).
    r = pl.reciprocal(x, approx=True)
    return r * (2.0 - x * r)


def _erf(x):
    # Abramowitz & Stegun 7.1.26 rational approximation (|err| < 1.5e-7), built only
    # from exp/mul/add/reciprocal so it lowers cleanly in Mosaic.
    a1, a2, a3, a4, a5 = 0.254829592, -0.284496736, 1.421413741, -1.453152027, 1.061405429
    p = 0.3275911
    sign = jnp.where(x < 0.0, -1.0, 1.0).astype(x.dtype)
    ax = jnp.abs(x)
    t = _recip(1.0 + p * ax)
    poly = ((((a5 * t + a4) * t + a3) * t + a2) * t + a1) * t
    return sign * (1.0 - poly * jnp.exp(-ax * ax))


def _gelu_exact(x):
    # HF BLIP uses exact (erf) GELU.
    return 0.5 * x * (1.0 + _erf(x * _SQRT1_2))


def _layer_norm(x, g, b):
    mu = jnp.mean(x, axis=-1, keepdims=True)
    var = jnp.mean((x - mu) ** 2, axis=-1, keepdims=True)
    return (x - mu) * lax.rsqrt(var + LN_EPS) * g + b


# --------------------------------- fused kernel --------------------------------
def _blip_fused_kernel(
    patches_ref,    # [B*NUM_PATCHES, PATCH_DIM] f32
    patch_w_ref,    # [PATCH_DIM, D]             bf16
    const_ref,      # [SEQ+4, D]                 f32   rows: pos[0:SEQ], patch_b, cls, post_g, post_b
    lvec_ref,       # [L, 8, 128]                f32   per-layer vectors, one per sublane row
    qkv_w_ref,      # [L, D, 3D]                 bf16  (attn scale folded into Q columns)
    proj_w_ref,     # [L, D, D]                  bf16
    fc1_w_ref,      # [L, D, MLP]                bf16
    fc2_w_ref,      # [L, MLP, D]                bf16
    cls_w_ref,      # [D, OUT_PAD]               bf16  (zero-padded past NUM_CLASSES)
    cls_b_ref,      # [1, OUT_PAD]               f32
    o_ref,          # [B, OUT_PAD]               f32   lane-dense logits slab
):
    f32 = jnp.float32
    bf16 = jnp.bfloat16

    pos = const_ref[0:SEQ, :]
    patch_b = const_ref[SEQ:SEQ + 1, :]
    cls_row = const_ref[SEQ + 1:SEQ + 2, :]
    post_g = const_ref[SEQ + 2:SEQ + 3, :]
    post_b = const_ref[SEQ + 3:SEQ + 4, :]

    # ---- patch embedding: Conv2d(kernel=stride=PATCH) for the whole batch as one matmul ----
    pe = jnp.dot(patches_ref[...].astype(bf16), patch_w_ref[...],
                 preferred_element_type=f32) + patch_b                 # [B*NP, D] f32

    # ---- assemble [cls ; patches] + positional embedding, kept in registers ----
    cls_tok = cls_row + pos[0:1, :]
    pos_patch = pos[1:SEQ, :]
    rows = []
    for b in range(BATCH):
        rows.append(cls_tok)
        rows.append(pe[b * NUM_PATCHES:(b + 1) * NUM_PATCHES, :] + pos_patch)
    h = jnp.concatenate(rows, axis=0)                                   # [ROWS, D] f32

    # ---- block-diagonal additive mask: tokens never attend across images, so the
    #      whole batch shares one score matmul per head (built once, reused per layer) ----
    r_idx = lax.broadcasted_iota(jnp.int32, (ROWS, ROWS), 0)
    c_idx = lax.broadcasted_iota(jnp.int32, (ROWS, ROWS), 1)
    same = None
    for b in range(BATCH):
        in_r = (r_idx >= b * SEQ) & (r_idx < (b + 1) * SEQ)
        in_c = (c_idx >= b * SEQ) & (c_idx < (b + 1) * SEQ)
        blk = in_r & in_c
        same = blk if same is None else (same | blk)
    neg_mask = jnp.where(same, 0.0, -1e30).astype(f32)                  # [ROWS, ROWS]

    # ---- transformer encoder layers (unrolled; all weights VMEM-resident) ----
    for l in range(NUM_LAYERS):
        lv = lvec_ref[l]                                                # [8, 128]
        ln1_g = lv[0:1, 0:HIDDEN]
        ln1_b = lv[1:2, 0:HIDDEN]
        qkv_b = lv[2:3, 0:3 * HIDDEN]
        proj_b = lv[3:4, 0:HIDDEN]
        ln2_g = lv[4:5, 0:HIDDEN]
        ln2_b = lv[5:6, 0:HIDDEN]
        fc1_b = lv[6:7, 0:MLP]
        fc2_b = lv[7:8, 0:HIDDEN]

        # --- self-attention block (pre-LN); attention scale pre-folded into Q ---
        x = _layer_norm(h, ln1_g, ln1_b)
        qkv = jnp.dot(x.astype(bf16), qkv_w_ref[l],
                      preferred_element_type=f32) + qkv_b               # [ROWS, 3D] f32
        head_ctx = []
        for hd in range(NUM_HEADS):
            lo = hd * HEAD_DIM
            q_h = qkv[:, lo:lo + HEAD_DIM]                              # [ROWS, Dh] (scaled)
            k_h = qkv[:, HIDDEN + lo:HIDDEN + lo + HEAD_DIM]
            v_h = qkv[:, 2 * HIDDEN + lo:2 * HIDDEN + lo + HEAD_DIM]
            s = lax.dot_general(q_h, k_h, (((1,), (1,)), ((), ())),
                                preferred_element_type=f32)             # [ROWS, ROWS]
            s = s + neg_mask
            s = s - jnp.max(s, axis=-1, keepdims=True)
            p = jnp.exp(s)
            # approx EUP reciprocal: ~2^-12 rel err in probabilities (inference-grade).
            p = p * pl.reciprocal(jnp.sum(p, axis=-1, keepdims=True), approx=True)
            head_ctx.append(jnp.dot(p, v_h, preferred_element_type=f32))
        attn = jnp.concatenate(head_ctx, axis=-1)                       # [ROWS, D], in vregs
        h = h + jnp.dot(attn.astype(bf16), proj_w_ref[l],
                        preferred_element_type=f32) + proj_b

        # --- MLP block (pre-LN) ---
        x = _layer_norm(h, ln2_g, ln2_b)
        y = jnp.dot(x.astype(bf16), fc1_w_ref[l],
                    preferred_element_type=f32) + fc1_b
        y = _gelu_exact(y)
        h = h + jnp.dot(y.astype(bf16), fc2_w_ref[l],
                        preferred_element_type=f32) + fc2_b

    # ---- BlipVisionModel post_layernorm on the full last_hidden_state ----
    h = _layer_norm(h, post_g, post_b)

    # ---- pooled = last_hidden_state.mean(dim=1); logits = classifier(pooled) ----
    pooled = jnp.concatenate(
        [jnp.mean(h[b * SEQ:(b + 1) * SEQ, :], axis=0, keepdims=True)
         for b in range(BATCH)], axis=0)                                # [B, D]
    logits = jnp.dot(pooled.astype(bf16), cls_w_ref[...],
                     preferred_element_type=f32) + cls_b_ref[...]       # [B, OUT_PAD] lane-dense
    o_ref[...] = logits.astype(o_ref.dtype)


# ------------------------------- parameters -----------------------------------
def init_params(key):
    keys = iter(jax.random.split(key, 8 + 6 * NUM_LAYERS))

    def nrm(shape):
        return 0.02 * jax.random.normal(next(keys), shape, jnp.float32)

    params = {
        # Conv2d(3, HIDDEN, kernel=PATCH, stride=PATCH) as matmul over (c, ph, pw) patches.
        "patch_w": nrm((PATCH_DIM, HIDDEN)),
        "patch_b": jnp.zeros((HIDDEN,), jnp.float32),
        "cls": nrm((1, 1, HIDDEN)),
        "pos": nrm((1, SEQ, HIDDEN)),
        "post_ln_g": jnp.ones((HIDDEN,), jnp.float32),
        "post_ln_b": jnp.zeros((HIDDEN,), jnp.float32),
        "cls_w": nrm((HIDDEN, NUM_CLASSES)),
        "cls_b": jnp.zeros((NUM_CLASSES,), jnp.float32),
        "layers": [],
    }
    for _ in range(NUM_LAYERS):
        params["layers"].append({
            "ln1_g": jnp.ones((HIDDEN,), jnp.float32),
            "ln1_b": jnp.zeros((HIDDEN,), jnp.float32),
            "qkv_w": nrm((HIDDEN, 3 * HIDDEN)),
            "qkv_b": jnp.zeros((3 * HIDDEN,), jnp.float32),
            "proj_w": nrm((HIDDEN, HIDDEN)),
            "proj_b": jnp.zeros((HIDDEN,), jnp.float32),
            "ln2_g": jnp.ones((HIDDEN,), jnp.float32),
            "ln2_b": jnp.zeros((HIDDEN,), jnp.float32),
            "fc1_w": nrm((HIDDEN, MLP)),
            "fc1_b": jnp.zeros((MLP,), jnp.float32),
            "fc2_w": nrm((MLP, HIDDEN)),
            "fc2_b": jnp.zeros((HIDDEN,), jnp.float32),
        })
    return params


def pack_params(params):
    """One-time packing (outside the hot path):
       * stack per-layer weights to [L, ...] and cast matmul weights to bf16,
       * fold the attention scale (HEAD_DIM ** -0.5) into the Q columns of qkv_w/qkv_b,
       * pack all per-layer bias/LN vectors into one (8,128)-aligned slab per layer,
       * pack pos/cls/patch-bias/post-LN into one small const array,
       * zero-pad the classifier to 128 output lanes (lane-dense kernel output)."""
    layers = params["layers"]
    bf16 = jnp.bfloat16

    def stack(name):
        return jnp.stack([lp[name] for lp in layers])

    scale = HEAD_DIM ** -0.5
    col_scale = jnp.concatenate(
        [jnp.full((HIDDEN,), scale, jnp.float32), jnp.ones((2 * HIDDEN,), jnp.float32)])
    qkv_w = (stack("qkv_w") * col_scale[None, None, :]).astype(bf16)        # [L, D, 3D]
    qkv_b = stack("qkv_b") * col_scale[None, :]                             # [L, 3D] f32

    def row(vecs, width):
        # [L, width] -> [L, 1, 128] zero-padded (one sublane row of the per-layer slab)
        pad = jnp.zeros((NUM_LAYERS, 128 - width), jnp.float32)
        return jnp.concatenate([vecs, pad], axis=-1)[:, None, :]

    lvec = jnp.concatenate([
        row(stack("ln1_g"), HIDDEN),       # row 0
        row(stack("ln1_b"), HIDDEN),       # row 1
        row(qkv_b, 3 * HIDDEN),            # row 2
        row(stack("proj_b"), HIDDEN),      # row 3
        row(stack("ln2_g"), HIDDEN),       # row 4
        row(stack("ln2_b"), HIDDEN),       # row 5
        row(stack("fc1_b"), MLP),          # row 6
        row(stack("fc2_b"), HIDDEN),       # row 7
    ], axis=1)                                                              # [L, 8, 128]

    const = jnp.concatenate([
        params["pos"].reshape(SEQ, HIDDEN),
        params["patch_b"].reshape(1, HIDDEN),
        params["cls"].reshape(1, HIDDEN),
        params["post_ln_g"].reshape(1, HIDDEN),
        params["post_ln_b"].reshape(1, HIDDEN),
    ], axis=0)                                                              # [SEQ+4, D] f32

    cls_w = jnp.zeros((HIDDEN, OUT_PAD), jnp.float32)
    cls_w = cls_w.at[:, :NUM_CLASSES].set(params["cls_w"]).astype(bf16)     # [D, 128]
    cls_b = jnp.zeros((1, OUT_PAD), jnp.float32)
    cls_b = cls_b.at[0, :NUM_CLASSES].set(params["cls_b"])                  # [1, 128]

    return (
        params["patch_w"].astype(bf16),   # patch_w
        const,                            # const
        lvec,                             # lvec
        qkv_w,                            # qkv_w
        stack("proj_w").astype(bf16),     # proj_w
        stack("fc1_w").astype(bf16),      # fc1_w
        stack("fc2_w").astype(bf16),      # fc2_w
        cls_w,                            # cls_w
        cls_b,                            # cls_b
    )


# ------------------------------ forward pass -----------------------------------
def blip_finetuner_forward(packed, pixel_values):
    B = pixel_values.shape[0]
    # Patchify NCHW -> [B*num_patches, C*P*P] with (c, ph, pw) flattening order,
    # matching PyTorch Conv2d(kernel=stride=PATCH) weight layout (layout-only XLA op).
    x = pixel_values.reshape(B, C_IN, GRID_HW, PATCH, GRID_HW, PATCH)
    x = x.transpose(0, 2, 4, 1, 3, 5).reshape(B * NUM_PATCHES, PATCH_DIM)

    # Single kernel invocation, no grid: whole arrays live in VMEM for the duration.
    vmem = lambda: pl.BlockSpec(memory_space=pltpu.MemorySpace.VMEM)
    out = pl.pallas_call(
        _blip_fused_kernel,
        out_shape=jax.ShapeDtypeStruct((B, OUT_PAD), jnp.float32),
        in_specs=[vmem() for _ in range(1 + len(packed))],
        out_specs=vmem(),
    )(x, *packed)
    return out[:, :NUM_CLASSES]


# ----------------------------------- main ---------------------------------------
if __name__ == "__main__":
    key = jax.random.PRNGKey(0)
    pkey, xkey = jax.random.split(key)
    params = init_params(pkey)
    packed = pack_params(params)        # scale-fold + stacking + bf16 cast done once
    pixel_values = jax.random.normal(xkey, (BATCH, C_IN, IMG, IMG), jnp.float32)

    fwd = jax.jit(blip_finetuner_forward)
    logits = fwd(packed, pixel_values)
    jax.block_until_ready(logits)
    assert logits.shape == (BATCH, NUM_CLASSES), logits.shape
    assert bool(jnp.all(jnp.isfinite(logits)))
    print("KERNEL_OK")
</pallas_src>

<mosaic_0001>
module attributes {stable_mosaic.version = 11 : i64} {
  func.func @_blip_fused_kernel(%arg0: memref<8x192xf32, #tpu.memory_space<vmem>>, %arg1: memref<192x32xbf16, #tpu.memory_space<vmem>>, %arg2: memref<9x32xf32, #tpu.memory_space<vmem>>, %arg3: memref<2x8x128xf32, #tpu.memory_space<vmem>>, %arg4: memref<2x32x96xbf16, #tpu.memory_space<vmem>>, %arg5: memref<2x32x32xbf16, #tpu.memory_space<vmem>>, %arg6: memref<2x32x64xbf16, #tpu.memory_space<vmem>>, %arg7: memref<2x64x32xbf16, #tpu.memory_space<vmem>>, %arg8: memref<32x128xbf16, #tpu.memory_space<vmem>>, %arg9: memref<1x128xf32, #tpu.memory_space<vmem>>, %arg10: memref<2x128xf32, #tpu.memory_space<vmem>>) attributes {dimension_semantics = [], scalar_prefetch = 0 : i64, scratch_operands = 0 : i64, tpu.core_type = #tpu.core_type<tc>} {
    %c0 = arith.constant 0 : index
    %c0_0 = arith.constant 0 : index
    %0 = vector.load %arg2[%c0, %c0_0] : memref<9x32xf32, #tpu.memory_space<vmem>>, vector<5x32xf32>
    %c5 = arith.constant 5 : index
    %c0_1 = arith.constant 0 : index
    %1 = vector.load %arg2[%c5, %c0_1] : memref<9x32xf32, #tpu.memory_space<vmem>>, vector<1x32xf32>
    %c6 = arith.constant 6 : index
    %c0_2 = arith.constant 0 : index
    %2 = vector.load %arg2[%c6, %c0_2] : memref<9x32xf32, #tpu.memory_space<vmem>>, vector<1x32xf32>
    %c7 = arith.constant 7 : index
    %c0_3 = arith.constant 0 : index
    %3 = vector.load %arg2[%c7, %c0_3] : memref<9x32xf32, #tpu.memory_space<vmem>>, vector<1x32xf32>
    %c8 = arith.constant 8 : index
    %c0_4 = arith.constant 0 : index
    %4 = vector.load %arg2[%c8, %c0_4] : memref<9x32xf32, #tpu.memory_space<vmem>>, vector<1x32xf32>
    %c0_5 = arith.constant 0 : index
    %c0_6 = arith.constant 0 : index
    %5 = vector.load %arg0[%c0_5, %c0_6] : memref<8x192xf32, #tpu.memory_space<vmem>>, vector<8x192xf32>
    %6 = arith.truncf %5 : vector<8x192xf32> to vector<8x192xbf16>
    %c0_7 = arith.constant 0 : index
    %c0_8 = arith.constant 0 : index
    %7 = vector.load %arg1[%c0_7, %c0_8] : memref<192x32xbf16, #tpu.memory_space<vmem>>, vector<192x32xbf16>
    %cst = arith.constant dense<0.000000e+00> : vector<8x32xf32>
    %8 = tpu.matmul %6, %7, %cst {dimension_numbers = #tpu.dot_dimension_numbers<[1], [0], [0], [1], [0, 0, 1, 1], [], []>} : vector<8x192xbf16>, vector<192x32xbf16>, vector<8x32xf32> -> vector<8x32xf32>
    %9 = vector.broadcast %1 : vector<1x32xf32> to vector<8x32xf32>
    %10 = arith.addf %8, %9 : vector<8x32xf32>
    %11 = vector.extract_strided_slice %0 {offsets = [0, 0], sizes = [1, 32], strides = [1, 1]} : vector<5x32xf32> to vector<1x32xf32>
    %12 = arith.addf %2, %11 : vector<1x32xf32>
    %13 = vector.extract_strided_slice %0 {offsets = [1, 0], sizes = [4, 32], strides = [1, 1]} : vector<5x32xf32> to vector<4x32xf32>
    %14 = vector.extract_strided_slice %10 {offsets = [0, 0], sizes = [4, 32], strides = [1, 1]} : vector<8x32xf32> to vector<4x32xf32>
    %15 = arith.addf %14, %13 : vector<4x32xf32>
    %16 = vector.extract_strided_slice %10 {offsets = [4, 0], sizes = [4, 32], strides = [1, 1]} : vector<8x32xf32> to vector<4x32xf32>
    %17 = arith.addf %16, %13 : vector<4x32xf32>
    %18 = tpu.concatenate %12, %15, %12, %17 in 0 : vector<1x32xf32>, vector<4x32xf32>, vector<1x32xf32>, vector<4x32xf32> -> vector<10x32xf32>
    %19 = tpu.iota {dimensions = array<i32: 0>} : vector<10x10xi32>
    %20 = tpu.iota {dimensions = array<i32: 1>} : vector<10x10xi32>
    %c0_i32 = arith.constant 0 : i32
    %21 = vector.broadcast %c0_i32 : i32 to vector<10x10xi32>
    %22 = arith.cmpi sge, %19, %21 : vector<10x10xi32>
    %c5_i32 = arith.constant 5 : i32
    %23 = vector.broadcast %c5_i32 : i32 to vector<10x10xi32>
    %24 = arith.cmpi slt, %19, %23 : vector<10x10xi32>
    %25 = arith.andi %22, %24 : vector<10x10xi1>
    %c0_i32_9 = arith.constant 0 : i32
    %26 = vector.broadcast %c0_i32_9 : i32 to vector<10x10xi32>
    %27 = arith.cmpi sge, %20, %26 : vector<10x10xi32>
    %c5_i32_10 = arith.constant 5 : i32
    %28 = vector.broadcast %c5_i32_10 : i32 to vector<10x10xi32>
    %29 = arith.cmpi slt, %20, %28 : vector<10x10xi32>
    %30 = arith.andi %27, %29 : vector<10x10xi1>
    %31 = arith.andi %25, %30 : vector<10x10xi1>
    %c5_i32_11 = arith.constant 5 : i32
    %32 = vector.broadcast %c5_i32_11 : i32 to vector<10x10xi32>
    %33 = arith.cmpi sge, %19, %32 : vector<10x10xi32>
    %c10_i32 = arith.constant 10 : i32
    %34 = vector.broadcast %c10_i32 : i32 to vector<10x10xi32>
    %35 = arith.cmpi slt, %19, %34 : vector<10x10xi32>
    %36 = arith.andi %33, %35 : vector<10x10xi1>
    %c5_i32_12 = arith.constant 5 : i32
    %37 = vector.broadcast %c5_i32_12 : i32 to vector<10x10xi32>
    %38 = arith.cmpi sge, %20, %37 : vector<10x10xi32>
    %c10_i32_13 = arith.constant 10 : i32
    %39 = vector.broadcast %c10_i32_13 : i32 to vector<10x10xi32>
    %40 = arith.cmpi slt, %20, %39 : vector<10x10xi32>
    %41 = arith.andi %38, %40 : vector<10x10xi1>
    %42 = arith.andi %36, %41 : vector<10x10xi1>
    %43 = arith.ori %31, %42 : vector<10x10xi1>
    %cst_14 = arith.constant 0.000000e+00 : f32
    %cst_15 = arith.constant -1.000000e+30 : f32
    %44 = vector.broadcast %cst_14 : f32 to vector<10x10xf32>
    %45 = vector.broadcast %cst_15 : f32 to vector<10x10xf32>
    %46 = arith.select %43, %44, %45 : vector<10x10xi1>, vector<10x10xf32>
    %c0_16 = arith.constant 0 : index
    %c0_17 = arith.constant 0 : index
    %c0_18 = arith.constant 0 : index
    %47 = vector.load %arg3[%c0_16, %c0_17, %c0_18] : memref<2x8x128xf32, #tpu.memory_space<vmem>>, vector<1x8x128xf32>
    %48 = vector.shape_cast %47 : vector<1x8x128xf32> to vector<8x128xf32>
    %49 = vector.extract_strided_slice %48 {offsets = [0, 0], sizes = [1, 32], strides = [1, 1]} : vector<8x128xf32> to vector<1x32xf32>
    %50 = vector.extract_strided_slice %48 {offsets = [1, 0], sizes = [1, 32], strides = [1, 1]} : vector<8x128xf32> to vector<1x32xf32>
    %51 = vector.extract_strided_slice %48 {offsets = [2, 0], sizes = [1, 96], strides = [1, 1]} : vector<8x128xf32> to vector<1x96xf32>
    %52 = vector.extract_strided_slice %48 {offsets = [3, 0], sizes = [1, 32], strides = [1, 1]} : vector<8x128xf32> to vector<1x32xf32>
    %53 = vector.extract_strided_slice %48 {offsets = [4, 0], sizes = [1, 32], strides = [1, 1]} : vector<8x128xf32> to vector<1x32xf32>
    %54 = vector.extract_strided_slice %48 {offsets = [5, 0], sizes = [1, 32], strides = [1, 1]} : vector<8x128xf32> to vector<1x32xf32>
    %55 = vector.extract_strided_slice %48 {offsets = [6, 0], sizes = [1, 64], strides = [1, 1]} : vector<8x128xf32> to vector<1x64xf32>
    %56 = vector.extract_strided_slice %48 {offsets = [7, 0], sizes = [1, 32], strides = [1, 1]} : vector<8x128xf32> to vector<1x32xf32>
    %cst_19 = arith.constant dense<0.000000e+00> : vector<10xf32>
    %57 = vector.multi_reduction <add>, %18, %cst_19 [1] : vector<10x32xf32> to vector<10xf32>
    %58 = vector.shape_cast %57 : vector<10xf32> to vector<10x1xf32>
    %cst_20 = arith.constant 3.200000e+01 : f32
    %59 = vector.broadcast %cst_20 : f32 to vector<10x1xf32>
    %60 = arith.divf %58, %59 : vector<10x1xf32>
    %61 = vector.broadcast %60 : vector<10x1xf32> to vector<10x32xf32>
    %62 = arith.subf %18, %61 : vector<10x32xf32>
    %63 = arith.mulf %62, %62 : vector<10x32xf32>
    %cst_21 = arith.constant dense<0.000000e+00> : vector<10xf32>
    %64 = vector.multi_reduction <add>, %63, %cst_21 [1] : vector<10x32xf32> to vector<10xf32>
    %65 = vector.shape_cast %64 : vector<10xf32> to vector<10x1xf32>
    %cst_22 = arith.constant 3.200000e+01 : f32
    %66 = vector.broadcast %cst_22 : f32 to vector<10x1xf32>
    %67 = arith.divf %65, %66 : vector<10x1xf32>
    %68 = vector.broadcast %60 : vector<10x1xf32> to vector<10x32xf32>
    %69 = arith.subf %18, %68 : vector<10x32xf32>
    %cst_23 = arith.constant 9.99999974E-6 : f32
    %70 = vector.broadcast %cst_23 : f32 to vector<10x1xf32>
    %71 = arith.addf %67, %70 : vector<10x1xf32>
    %72 = math.rsqrt %71 : vector<10x1xf32>
    %73 = vector.broadcast %72 : vector<10x1xf32> to vector<10x32xf32>
    %74 = arith.mulf %69, %73 : vector<10x32xf32>
    %75 = vector.broadcast %49 : vector<1x32xf32> to vector<10x32xf32>
    %76 = arith.mulf %74, %75 : vector<10x32xf32>
    %77 = vector.broadcast %50 : vector<1x32xf32> to vector<10x32xf32>
    %78 = arith.addf %76, %77 : vector<10x32xf32>
    %79 = arith.truncf %78 : vector<10x32xf32> to vector<10x32xbf16>
    %c0_24 = arith.constant 0 : index
    %c0_25 = arith.constant 0 : index
    %c0_26 = arith.constant 0 : index
    %80 = vector.load %arg4[%c0_24, %c0_25, %c0_26] : memref<2x32x96xbf16, #tpu.memory_space<vmem>>, vector<1x32x96xbf16>
    %81 = vector.shape_cast %80 : vector<1x32x96xbf16> to vector<32x96xbf16>
    %cst_27 = arith.constant dense<0.000000e+00> : vector<10x96xf32>
    %82 = tpu.matmul %79, %81, %cst_27 {dimension_numbers = #tpu.dot_dimension_numbers<[1], [0], [0], [1], [0, 0, 1, 1], [], []>} : vector<10x32xbf16>, vector<32x96xbf16>, vector<10x96xf32> -> vector<10x96xf32>
    %83 = vector.broadcast %51 : vector<1x96xf32> to vector<10x96xf32>
    %84 = arith.addf %82, %83 : vector<10x96xf32>
    %85 = vector.extract_strided_slice %84 {offsets = [0, 0], sizes = [10, 8], strides = [1, 1]} : vector<10x96xf32> to vector<10x8xf32>
    %86 = vector.extract_strided_slice %84 {offsets = [0, 32], sizes = [10, 8], strides = [1, 1]} : vector<10x96xf32> to vector<10x8xf32>
    %87 = vector.extract_strided_slice %84 {offsets = [0, 64], sizes = [10, 8], strides = [1, 1]} : vector<10x96xf32> to vector<10x8xf32>
    %cst_28 = arith.constant dense<0.000000e+00> : vector<10x10xf32>
    %88 = tpu.matmul %85, %86, %cst_28 {dimension_numbers = #tpu.dot_dimension_numbers<[1], [1], [0], [0], [0, 0, 1, 0], [], []>} : vector<10x8xf32>, vector<10x8xf32>, vector<10x10xf32> -> vector<10x10xf32>
    %89 = arith.addf %88, %46 : vector<10x10xf32>
    %cst_29 = arith.constant dense<0xFF800000> : vector<10xf32>
    %90 = vector.multi_reduction <maximumf>, %89, %cst_29 [1] : vector<10x10xf32> to vector<10xf32>
    %91 = vector.shape_cast %90 : vector<10xf32> to vector<10x1xf32>
    %92 = vector.broadcast %91 : vector<10x1xf32> to vector<10x10xf32>
    %93 = arith.subf %89, %92 : vector<10x10xf32>
    %94 = math.exp %93 : vector<10x10xf32>
    %cst_30 = arith.constant dense<0.000000e+00> : vector<10xf32>
    %95 = vector.multi_reduction <add>, %94, %cst_30 [1] : vector<10x10xf32> to vector<10xf32>
    %96 = vector.shape_cast %95 : vector<10xf32> to vector<10x1xf32>
    %97 = tpu.reciprocal %96 {approx = true} : vector<10x1xf32> -> vector<10x1xf32>
    %98 = vector.broadcast %97 : vector<10x1xf32> to vector<10x10xf32>
    %99 = arith.mulf %94, %98 : vector<10x10xf32>
    %cst_31 = arith.constant dense<0.000000e+00> : vector<10x8xf32>
    %100 = tpu.matmul %99, %87, %cst_31 {dimension_numbers = #tpu.dot_dimension_numbers<[1], [0], [0], [1], [0, 0, 1, 1], [], []>} : vector<10x10xf32>, vector<10x8xf32>, vector<10x8xf32> -> vector<10x8xf32>
    %101 = vector.extract_strided_slice %84 {offsets = [0, 8], sizes = [10, 8], strides = [1, 1]} : vector<10x96xf32> to vector<10x8xf32>
    %102 = vector.extract_strided_slice %84 {offsets = [0, 40], sizes = [10, 8], strides = [1, 1]} : vector<10x96xf32> to vector<10x8xf32>
    %103 = vector.extract_strided_slice %84 {offsets = [0, 72], sizes = [10, 8], strides = [1, 1]} : vector<10x96xf32> to vector<10x8xf32>
    %cst_32 = arith.constant dense<0.000000e+00> : vector<10x10xf32>
    %104 = tpu.matmul %101, %102, %cst_32 {dimension_numbers = #tpu.dot_dimension_numbers<[1], [1], [0], [0], [0, 0, 1, 0], [], []>} : vector<10x8xf32>, vector<10x8xf32>, vector<10x10xf32> -> vector<10x10xf32>
    %105 = arith.addf %104, %46 : vector<10x10xf32>
    %cst_33 = arith.constant dense<0xFF800000> : vector<10xf32>
    %106 = vector.multi_reduction <maximumf>, %105, %cst_33 [1] : vector<10x10xf32> to vector<10xf32>
    %107 = vector.shape_cast %106 : vector<10xf32> to vector<10x1xf32>
    %108 = vector.broadcast %107 : vector<10x1xf32> to vector<10x10xf32>
    %109 = arith.subf %105, %108 : vector<10x10xf32>
    %110 = math.exp %109 : vector<10x10xf32>
    %cst_34 = arith.constant dense<0.000000e+00> : vector<10xf32>
    %111 = vector.multi_reduction <add>, %110, %cst_34 [1] : vector<10x10xf32> to vector<10xf32>
    %112 = vector.shape_cast %111 : vector<10xf32> to vector<10x1xf32>
    %113 = tpu.reciprocal %112 {approx = true} : vector<10x1xf32> -> vector<10x1xf32>
    %114 = vector.broadcast %113 : vector<10x1xf32> to vector<10x10xf32>
    %115 = arith.mulf %110, %114 : vector<10x10xf32>
    %cst_35 = arith.constant dense<0.000000e+00> : vector<10x8xf32>
    %116 = tpu.matmul %115, %103, %cst_35 {dimension_numbers = #tpu.dot_dimension_numbers<[1], [0], [0], [1], [0, 0, 1, 1], [], []>} : vector<10x10xf32>, vector<10x8xf32>, vector<10x8xf32> -> vector<10x8xf32>
    %117 = vector.extract_strided_slice %84 {offsets = [0, 16], sizes = [10, 8], strides = [1, 1]} : vector<10x96xf32> to vector<10x8xf32>
    %118 = vector.extract_strided_slice %84 {offsets = [0, 48], sizes = [10, 8], strides = [1, 1]} : vector<10x96xf32> to vector<10x8xf32>
    %119 = vector.extract_strided_slice %84 {offsets = [0, 80], sizes = [10, 8], strides = [1, 1]} : vector<10x96xf32> to vector<10x8xf32>
    %cst_36 = arith.constant dense<0.000000e+00> : vector<10x10xf32>
    %120 = tpu.matmul %117, %118, %cst_36 {dimension_numbers = #tpu.dot_dimension_numbers<[1], [1], [0], [0], [0, 0, 1, 0], [], []>} : vector<10x8xf32>, vector<10x8xf32>, vector<10x10xf32> -> vector<10x10xf32>
    %121 = arith.addf %120, %46 : vector<10x10xf32>
    %cst_37 = arith.constant dense<0xFF800000> : vector<10xf32>
    %122 = vector.multi_reduction <maximumf>, %121, %cst_37 [1] : vector<10x10xf32> to vector<10xf32>
    %123 = vector.shape_cast %122 : vector<10xf32> to vector<10x1xf32>
    %124 = vector.broadcast %123 : vector<10x1xf32> to vector<10x10xf32>
    %125 = arith.subf %121, %124 : vector<10x10xf32>
    %126 = math.exp %125 : vector<10x10xf32>
    %cst_38 = arith.constant dense<0.000000e+00> : vector<10xf32>
    %127 = vector.multi_reduction <add>, %126, %cst_38 [1] : vector<10x10xf32> to vector<10xf32>
    %128 = vector.shape_cast %127 : vector<10xf32> to vector<10x1xf32>
    %129 = tpu.reciprocal %128 {approx = true} : vector<10x1xf32> -> vector<10x1xf32>
    %130 = vector.broadcast %129 : vector<10x1xf32> to vector<10x10xf32>
    %131 = arith.mulf %126, %130 : vector<10x10xf32>
    %cst_39 = arith.constant dense<0.000000e+00> : vector<10x8xf32>
    %132 = tpu.matmul %131, %119, %cst_39 {dimension_numbers = #tpu.dot_dimension_numbers<[1], [0], [0], [1], [0, 0, 1, 1], [], []>} : vector<10x10xf32>, vector<10x8xf32>, vector<10x8xf32> -> vector<10x8xf32>
    %133 = vector.extract_strided_slice %84 {offsets = [0, 24], sizes = [10, 8], strides = [1, 1]} : vector<10x96xf32> to vector<10x8xf32>
    %134 = vector.extract_strided_slice %84 {offsets = [0, 56], sizes = [10, 8], strides = [1, 1]} : vector<10x96xf32> to vector<10x8xf32>
    %135 = vector.extract_strided_slice %84 {offsets = [0, 88], sizes = [10, 8], strides = [1, 1]} : vector<10x96xf32> to vector<10x8xf32>
    %cst_40 = arith.constant dense<0.000000e+00> : vector<10x10xf32>
    %136 = tpu.matmul %133, %134, %cst_40 {dimension_numbers = #tpu.dot_dimension_numbers<[1], [1], [0], [0], [0, 0, 1, 0], [], []>} : vector<10x8xf32>, vector<10x8xf32>, vector<10x10xf32> -> vector<10x10xf32>
    %137 = arith.addf %136, %46 : vector<10x10xf32>
    %cst_41 = arith.constant dense<0xFF800000> : vector<10xf32>
    %138 = vector.multi_reduction <maximumf>, %137, %cst_41 [1] : vector<10x10xf32> to vector<10xf32>
    %139 = vector.shape_cast %138 : vector<10xf32> to vector<10x1xf32>
    %140 = vector.broadcast %139 : vector<10x1xf32> to vector<10x10xf32>
    %141 = arith.subf %137, %140 : vector<10x10xf32>
    %142 = math.exp %141 : vector<10x10xf32>
    %cst_42 = arith.constant dense<0.000000e+00> : vector<10xf32>
    %143 = vector.multi_reduction <add>, %142, %cst_42 [1] : vector<10x10xf32> to vector<10xf32>
    %144 = vector.shape_cast %143 : vector<10xf32> to vector<10x1xf32>
    %145 = tpu.reciprocal %144 {approx = true} : vector<10x1xf32> -> vector<10x1xf32>
    %146 = vector.broadcast %145 : vector<10x1xf32> to vector<10x10xf32>
    %147 = arith.mulf %142, %146 : vector<10x10xf32>
    %cst_43 = arith.constant dense<0.000000e+00> : vector<10x8xf32>
    %148 = tpu.matmul %147, %135, %cst_43 {dimension_numbers = #tpu.dot_dimension_numbers<[1], [0], [0], [1], [0, 0, 1, 1], [], []>} : vector<10x10xf32>, vector<10x8xf32>, vector<10x8xf32> -> vector<10x8xf32>
    %149 = tpu.concatenate %100, %116, %132, %148 in 1 : vector<10x8xf32>, vector<10x8xf32>, vector<10x8xf32>, vector<10x8xf32> -> vector<10x32xf32>
    %150 = arith.truncf %149 : vector<10x32xf32> to vector<10x32xbf16>
    %c0_44 = arith.constant 0 : index
    %c0_45 = arith.constant 0 : index
    %c0_46 = arith.constant 0 : index
    %151 = vector.load %arg5[%c0_44, %c0_45, %c0_46] : memref<2x32x32xbf16, #tpu.memory_space<vmem>>, vector<1x32x32xbf16>
    %152 = vector.shape_cast %151 : vector<1x32x32xbf16> to vector<32x32xbf16>
    %cst_47 = arith.constant dense<0.000000e+00> : vector<10x32xf32>
    %153 = tpu.matmul %150, %152, %cst_47 {dimension_numbers = #tpu.dot_dimension_numbers<[1], [0], [0], [1], [0, 0, 1, 1], [], []>} : vector<10x32xbf16>, vector<32x32xbf16>, vector<10x32xf32> -> vector<10x32xf32>
    %154 = arith.addf %18, %153 : vector<10x32xf32>
    %155 = vector.broadcast %52 : vector<1x32xf32> to vector<10x32xf32>
    %156 = arith.addf %154, %155 : vector<10x32xf32>
    %cst_48 = arith.constant dense<0.000000e+00> : vector<10xf32>
    %157 = vector.multi_reduction <add>, %156, %cst_48 [1] : vector<10x32xf32> to vector<10xf32>
    %158 = vector.shape_cast %157 : vector<10xf32> to vector<10x1xf32>
    %cst_49 = arith.constant 3.200000e+01 : f32
    %159 = vector.broadcast %cst_49 : f32 to vector<10x1xf32>
    %160 = arith.divf %158, %159 : vector<10x1xf32>
    %161 = vector.broadcast %160 : vector<10x1xf32> to vector<10x32xf32>
    %162 = arith.subf %156, %161 : vector<10x32xf32>
    %163 = arith.mulf %162, %162 : vector<10x32xf32>
    %cst_50 = arith.constant dense<0.000000e+00> : vector<10xf32>
    %164 = vector.multi_reduction <add>, %163, %cst_50 [1] : vector<10x32xf32> to vector<10xf32>
    %165 = vector.shape_cast %164 : vector<10xf32> to vector<10x1xf32>
    %cst_51 = arith.constant 3.200000e+01 : f32
    %166 = vector.broadcast %cst_51 : f32 to vector<10x1xf32>
    %167 = arith.divf %165, %166 : vector<10x1xf32>
    %168 = vector.broadcast %160 : vector<10x1xf32> to vector<10x32xf32>
    %169 = arith.subf %156, %168 : vector<10x32xf32>
    %cst_52 = arith.constant 9.99999974E-6 : f32
    %170 = vector.broadcast %cst_52 : f32 to vector<10x1xf32>
    %171 = arith.addf %167, %170 : vector<10x1xf32>
    %172 = math.rsqrt %171 : vector<10x1xf32>
    %173 = vector.broadcast %172 : vector<10x1xf32> to vector<10x32xf32>
    %174 = arith.mulf %169, %173 : vector<10x32xf32>
    %175 = vector.broadcast %53 : vector<1x32xf32> to vector<10x32xf32>
    %176 = arith.mulf %174, %175 : vector<10x32xf32>
    %177 = vector.broadcast %54 : vector<1x32xf32> to vector<10x32xf32>
    %178 = arith.addf %176, %177 : vector<10x32xf32>
    %179 = arith.truncf %178 : vector<10x32xf32> to vector<10x32xbf16>
    %c0_53 = arith.constant 0 : index
    %c0_54 = arith.constant 0 : index
    %c0_55 = arith.constant 0 : index
    %180 = vector.load %arg6[%c0_53, %c0_54, %c0_55] : memref<2x32x64xbf16, #tpu.memory_space<vmem>>, vector<1x32x64xbf16>
    %181 = vector.shape_cast %180 : vector<1x32x64xbf16> to vector<32x64xbf16>
    %cst_56 = arith.constant dense<0.000000e+00> : vector<10x64xf32>
    %182 = tpu.matmul %179, %181, %cst_56 {dimension_numbers = #tpu.dot_dimension_numbers<[1], [0], [0], [1], [0, 0, 1, 1], [], []>} : vector<10x32xbf16>, vector<32x64xbf16>, vector<10x64xf32> -> vector<10x64xf32>
    %183 = vector.broadcast %55 : vector<1x64xf32> to vector<10x64xf32>
    %184 = arith.addf %182, %183 : vector<10x64xf32>
    %cst_57 = arith.constant 5.000000e-01 : f32
    %185 = vector.broadcast %cst_57 : f32 to vector<10x64xf32>
    %186 = arith.mulf %185, %184 : vector<10x64xf32>
    %cst_58 = arith.constant 0.707106769 : f32
    %187 = vector.broadcast %cst_58 : f32 to vector<10x64xf32>
    %188 = arith.mulf %184, %187 : vector<10x64xf32>
    %cst_59 = arith.constant 0.000000e+00 : f32
    %189 = vector.broadcast %cst_59 : f32 to vector<10x64xf32>
    %190 = arith.cmpf olt, %188, %189 : vector<10x64xf32>
    %cst_60 = arith.constant -1.000000e+00 : f32
    %cst_61 = arith.constant 1.000000e+00 : f32
    %191 = vector.broadcast %cst_60 : f32 to vector<10x64xf32>
    %192 = vector.broadcast %cst_61 : f32 to vector<10x64xf32>
    %193 = arith.select %190, %191, %192 : vector<10x64xi1>, vector<10x64xf32>
    %194 = math.absf %188 : vector<10x64xf32>
    %cst_62 = arith.constant 0.327591091 : f32
    %195 = vector.broadcast %cst_62 : f32 to vector<10x64xf32>
    %196 = arith.mulf %195, %194 : vector<10x64xf32>
    %cst_63 = arith.constant 1.000000e+00 : f32
    %197 = vector.broadcast %cst_63 : f32 to vector<10x64xf32>
    %198 = arith.addf %197, %196 : vector<10x64xf32>
    %199 = tpu.reciprocal %198 {approx = true} : vector<10x64xf32> -> vector<10x64xf32>
    %200 = arith.mulf %198, %199 : vector<10x64xf32>
    %cst_64 = arith.constant 2.000000e+00 : f32
    %201 = vector.broadcast %cst_64 : f32 to vector<10x64xf32>
    %202 = arith.subf %201, %200 : vector<10x64xf32>
    %203 = arith.mulf %199, %202 : vector<10x64xf32>
    %cst_65 = arith.constant 1.06140542 : f32
    %204 = vector.broadcast %cst_65 : f32 to vector<10x64xf32>
    %205 = arith.mulf %204, %203 : vector<10x64xf32>
    %cst_66 = arith.constant -1.45315206 : f32
    %206 = vector.broadcast %cst_66 : f32 to vector<10x64xf32>
    %207 = arith.addf %205, %206 : vector<10x64xf32>
    %208 = arith.mulf %207, %203 : vector<10x64xf32>
    %cst_67 = arith.constant 1.42141378 : f32
    %209 = vector.broadcast %cst_67 : f32 to vector<10x64xf32>
    %210 = arith.addf %208, %209 : vector<10x64xf32>
    %211 = arith.mulf %210, %203 : vector<10x64xf32>
    %cst_68 = arith.constant -0.284496725 : f32
    %212 = vector.broadcast %cst_68 : f32 to vector<10x64xf32>
    %213 = arith.addf %211, %212 : vector<10x64xf32>
    %214 = arith.mulf %213, %203 : vector<10x64xf32>
    %cst_69 = arith.constant 0.254829586 : f32
    %215 = vector.broadcast %cst_69 : f32 to vector<10x64xf32>
    %216 = arith.addf %214, %215 : vector<10x64xf32>
    %217 = arith.mulf %216, %203 : vector<10x64xf32>
    %cst_70 = arith.constant 0.000000e+00 : f32
    %218 = vector.broadcast %cst_70 : f32 to vector<10x64xf32>
    %219 = arith.subf %218, %194 : vector<10x64xf32>
    %220 = arith.mulf %219, %194 : vector<10x64xf32>
    %221 = math.exp %220 : vector<10x64xf32>
    %222 = arith.mulf %217, %221 : vector<10x64xf32>
    %cst_71 = arith.constant 1.000000e+00 : f32
    %223 = vector.broadcast %cst_71 : f32 to vector<10x64xf32>
    %224 = arith.subf %223, %222 : vector<10x64xf32>
    %225 = arith.mulf %193, %224 : vector<10x64xf32>
    %cst_72 = arith.constant 1.000000e+00 : f32
    %226 = vector.broadcast %cst_72 : f32 to vector<10x64xf32>
    %227 = arith.addf %226, %225 : vector<10x64xf32>
    %228 = arith.mulf %186, %227 : vector<10x64xf32>
    %229 = arith.truncf %228 : vector<10x64xf32> to vector<10x64xbf16>
    %c0_73 = arith.constant 0 : index
    %c0_74 = arith.constant 0 : index
    %c0_75 = arith.constant 0 : index
    %230 = vector.load %arg7[%c0_73, %c0_74, %c0_75] : memref<2x64x32xbf16, #tpu.memory_space<vmem>>, vector<1x64x32xbf16>
    %231 = vector.shape_cast %230 : vector<1x64x32xbf16> to vector<64x32xbf16>
    %cst_76 = arith.constant dense<0.000000e+00> : vector<10x32xf32>
    %232 = tpu.matmul %229, %231, %cst_76 {dimension_numbers = #tpu.dot_dimension_numbers<[1], [0], [0], [1], [0, 0, 1, 1], [], []>} : vector<10x64xbf16>, vector<64x32xbf16>, vector<10x32xf32> -> vector<10x32xf32>
    %233 = arith.addf %156, %232 : vector<10x32xf32>
    %234 = vector.broadcast %56 : vector<1x32xf32> to vector<10x32xf32>
    %235 = arith.addf %233, %234 : vector<10x32xf32>
    %c1 = arith.constant 1 : index
    %c0_77 = arith.constant 0 : index
    %c0_78 = arith.constant 0 : index
    %236 = vector.load %arg3[%c1, %c0_77, %c0_78] : memref<2x8x128xf32, #tpu.memory_space<vmem>>, vector<1x8x128xf32>
    %237 = vector.shape_cast %236 : vector<1x8x128xf32> to vector<8x128xf32>
    %238 = vector.extract_strided_slice %237 {offsets = [0, 0], sizes = [1, 32], strides = [1, 1]} : vector<8x128xf32> to vector<1x32xf32>
    %239 = vector.extract_strided_slice %237 {offsets = [1, 0], sizes = [1, 32], strides = [1, 1]} : vector<8x128xf32> to vector<1x32xf32>
    %240 = vector.extract_strided_slice %237 {offsets = [2, 0], sizes = [1, 96], strides = [1, 1]} : vector<8x128xf32> to vector<1x96xf32>
    %241 = vector.extract_strided_slice %237 {offsets = [3, 0], sizes = [1, 32], strides = [1, 1]} : vector<8x128xf32> to vector<1x32xf32>
    %242 = vector.extract_strided_slice %237 {offsets = [4, 0], sizes = [1, 32], strides = [1, 1]} : vector<8x128xf32> to vector<1x32xf32>
    %243 = vector.extract_strided_slice %237 {offsets = [5, 0], sizes = [1, 32], strides = [1, 1]} : vector<8x128xf32> to vector<1x32xf32>
    %244 = vector.extract_strided_slice %237 {offsets = [6, 0], sizes = [1, 64], strides = [1, 1]} : vector<8x128xf32> to vector<1x64xf32>
    %245 = vector.extract_strided_slice %237 {offsets = [7, 0], sizes = [1, 32], strides = [1, 1]} : vector<8x128xf32> to vector<1x32xf32>
    %cst_79 = arith.constant dense<0.000000e+00> : vector<10xf32>
    %246 = vector.multi_reduction <add>, %235, %cst_79 [1] : vector<10x32xf32> to vector<10xf32>
    %247 = vector.shape_cast %246 : vector<10xf32> to vector<10x1xf32>
    %cst_80 = arith.constant 3.200000e+01 : f32
    %248 = vector.broadcast %cst_80 : f32 to vector<10x1xf32>
    %249 = arith.divf %247, %248 : vector<10x1xf32>
    %250 = vector.broadcast %249 : vector<10x1xf32> to vector<10x32xf32>
    %251 = arith.subf %235, %250 : vector<10x32xf32>
    %252 = arith.mulf %251, %251 : vector<10x32xf32>
    %cst_81 = arith.constant dense<0.000000e+00> : vector<10xf32>
    %253 = vector.multi_reduction <add>, %252, %cst_81 [1] : vector<10x32xf32> to vector<10xf32>
    %254 = vector.shape_cast %253 : vector<10xf32> to vector<10x1xf32>
    %cst_82 = arith.constant 3.200000e+01 : f32
    %255 = vector.broadcast %cst_82 : f32 to vector<10x1xf32>
    %256 = arith.divf %254, %255 : vector<10x1xf32>
    %257 = vector.broadcast %249 : vector<10x1xf32> to vector<10x32xf32>
    %258 = arith.subf %235, %257 : vector<10x32xf32>
    %cst_83 = arith.constant 9.99999974E-6 : f32
    %259 = vector.broadcast %cst_83 : f32 to vector<10x1xf32>
    %260 = arith.addf %256, %259 : vector<10x1xf32>
    %261 = math.rsqrt %260 : vector<10x1xf32>
    %262 = vector.broadcast %261 : vector<10x1xf32> to vector<10x32xf32>
    %263 = arith.mulf %258, %262 : vector<10x32xf32>
    %264 = vector.broadcast %238 : vector<1x32xf32> to vector<10x32xf32>
    %265 = arith.mulf %263, %264 : vector<10x32xf32>
    %266 = vector.broadcast %239 : vector<1x32xf32> to vector<10x32xf32>
    %267 = arith.addf %265, %266 : vector<10x32xf32>
    %268 = arith.truncf %267 : vector<10x32xf32> to vector<10x32xbf16>
    %c1_84 = arith.constant 1 : index
    %c0_85 = arith.constant 0 : index
    %c0_86 = arith.constant 0 : index
    %269 = vector.load %arg4[%c1_84, %c0_85, %c0_86] : memref<2x32x96xbf16, #tpu.memory_space<vmem>>, vector<1x32x96xbf16>
    %270 = vector.shape_cast %269 : vector<1x32x96xbf16> to vector<32x96xbf16>
    %cst_87 = arith.constant dense<0.000000e+00> : vector<10x96xf32>
    %271 = tpu.matmul %268, %270, %cst_87 {dimension_numbers = #tpu.dot_dimension_numbers<[1], [0], [0], [1], [0, 0, 1, 1], [], []>} : vector<10x32xbf16>, vector<32x96xbf16>, vector<10x96xf32> -> vector<10x96xf32>
    %272 = vector.broadcast %240 : vector<1x96xf32> to vector<10x96xf32>
    %273 = arith.addf %271, %272 : vector<10x96xf32>
    %274 = vector.extract_strided_slice %273 {offsets = [0, 0], sizes = [10, 8], strides = [1, 1]} : vector<10x96xf32> to vector<10x8xf32>
    %275 = vector.extract_strided_slice %273 {offsets = [0, 32], sizes = [10, 8], strides = [1, 1]} : vector<10x96xf32> to vector<10x8xf32>
    %276 = vector.extract_strided_slice %273 {offsets = [0, 64], sizes = [10, 8], strides = [1, 1]} : vector<10x96xf32> to vector<10x8xf32>
    %cst_88 = arith.constant dense<0.000000e+00> : vector<10x10xf32>
    %277 = tpu.matmul %274, %275, %cst_88 {dimension_numbers = #tpu.dot_dimension_numbers<[1], [1], [0], [0], [0, 0, 1, 0], [], []>} : vector<10x8xf32>, vector<10x8xf32>, vector<10x10xf32> -> vector<10x10xf32>
    %278 = arith.addf %277, %46 : vector<10x10xf32>
    %cst_89 = arith.constant dense<0xFF800000> : vector<10xf32>
    %279 = vector.multi_reduction <maximumf>, %278, %cst_89 [1] : vector<10x10xf32> to vector<10xf32>
    %280 = vector.shape_cast %279 : vector<10xf32> to vector<10x1xf32>
    %281 = vector.broadcast %280 : vector<10x1xf32> to vector<10x10xf32>
    %282 = arith.subf %278, %281 : vector<10x10xf32>
    %283 = math.exp %282 : vector<10x10xf32>
    %cst_90 = arith.constant dense<0.000000e+00> : vector<10xf32>
    %284 = vector.multi_reduction <add>, %283, %cst_90 [1] : vector<10x10xf32> to vector<10xf32>
    %285 = vector.shape_cast %284 : vector<10xf32> to vector<10x1xf32>
    %286 = tpu.reciprocal %285 {approx = true} : vector<10x1xf32> -> vector<10x1xf32>
    %287 = vector.broadcast %286 : vector<10x1xf32> to vector<10x10xf32>
    %288 = arith.mulf %283, %287 : vector<10x10xf32>
    %cst_91 = arith.constant dense<0.000000e+00> : vector<10x8xf32>
    %289 = tpu.matmul %288, %276, %cst_91 {dimension_numbers = #tpu.dot_dimension_numbers<[1], [0], [0], [1], [0, 0, 1, 1], [], []>} : vector<10x10xf32>, vector<10x8xf32>, vector<10x8xf32> -> vector<10x8xf32>
    %290 = vector.extract_strided_slice %273 {offsets = [0, 8], sizes = [10, 8], strides = [1, 1]} : vector<10x96xf32> to vector<10x8xf32>
    %291 = vector.extract_strided_slice %273 {offsets = [0, 40], sizes = [10, 8], strides = [1, 1]} : vector<10x96xf32> to vector<10x8xf32>
    %292 = vector.extract_strided_slice %273 {offsets = [0, 72], sizes = [10, 8], strides = [1, 1]} : vector<10x96xf32> to vector<10x8xf32>
    %cst_92 = arith.constant dense<0.000000e+00> : vector<10x10xf32>
    %293 = tpu.matmul %290, %291, %cst_92 {dimension_numbers = #tpu.dot_dimension_numbers<[1], [1], [0], [0], [0, 0, 1, 0], [], []>} : vector<10x8xf32>, vector<10x8xf32>, vector<10x10xf32> -> vector<10x10xf32>
    %294 = arith.addf %293, %46 : vector<10x10xf32>
    %cst_93 = arith.constant dense<0xFF800000> : vector<10xf32>
    %295 = vector.multi_reduction <maximumf>, %294, %cst_93 [1] : vector<10x10xf32> to vector<10xf32>
    %296 = vector.shape_cast %295 : vector<10xf32> to vector<10x1xf32>
    %297 = vector.broadcast %296 : vector<10x1xf32> to vector<10x10xf32>
    %298 = arith.subf %294, %297 : vector<10x10xf32>
    %299 = math.exp %298 : vector<10x10xf32>
    %cst_94 = arith.constant dense<0.000000e+00> : vector<10xf32>
    %300 = vector.multi_reduction <add>, %299, %cst_94 [1] : vector<10x10xf32> to vector<10xf32>
    %301 = vector.shape_cast %300 : vector<10xf32> to vector<10x1xf32>
    %302 = tpu.reciprocal %301 {approx = true} : vector<10x1xf32> -> vector<10x1xf32>
    %303 = vector.broadcast %302 : vector<10x1xf32> to vector<10x10xf32>
    %304 = arith.mulf %299, %303 : vector<10x10xf32>
    %cst_95 = arith.constant dense<0.000000e+00> : vector<10x8xf32>
    %305 = tpu.matmul %304, %292, %cst_95 {dimension_numbers = #tpu.dot_dimension_numbers<[1], [0], [0], [1], [0, 0, 1, 1], [], []>} : vector<10x10xf32>, vector<10x8xf32>, vector<10x8xf32> -> vector<10x8xf32>
    %306 = vector.extract_strided_slice %273 {offsets = [0, 16], sizes = [10, 8], strides = [1, 1]} : vector<10x96xf32> to vector<10x8xf32>
    %307 = vector.extract_strided_slice %273 {offsets = [0, 48], sizes = [10, 8], strides = [1, 1]} : vector<10x96xf32> to vector<10x8xf32>
    %308 = vector.extract_strided_slice %273 {offsets = [0, 80], sizes = [10, 8], strides = [1, 1]} : vector<10x96xf32> to vector<10x8xf32>
    %cst_96 = arith.constant dense<0.000000e+00> : vector<10x10xf32>
    %309 = tpu.matmul %306, %307, %cst_96 {dimension_numbers = #tpu.dot_dimension_numbers<[1], [1], [0], [0], [0, 0, 1, 0], [], []>} : vector<10x8xf32>, vector<10x8xf32>, vector<10x10xf32> -> vector<10x10xf32>
    %310 = arith.addf %309, %46 : vector<10x10xf32>
    %cst_97 = arith.constant dense<0xFF800000> : vector<10xf32>
    %311 = vector.multi_reduction <maximumf>, %310, %cst_97 [1] : vector<10x10xf32> to vector<10xf32>
    %312 = vector.shape_cast %311 : vector<10xf32> to vector<10x1xf32>
    %313 = vector.broadcast %312 : vector<10x1xf32> to vector<10x10xf32>
    %314 = arith.subf %310, %313 : vector<10x10xf32>
    %315 = math.exp %314 : vector<10x10xf32>
    %cst_98 = arith.constant dense<0.000000e+00> : vector<10xf32>
    %316 = vector.multi_reduction <add>, %315, %cst_98 [1] : vector<10x10xf32> to vector<10xf32>
    %317 = vector.shape_cast %316 : vector<10xf32> to vector<10x1xf32>
    %318 = tpu.reciprocal %317 {approx = true} : vector<10x1xf32> -> vector<10x1xf32>
    %319 = vector.broadcast %318 : vector<10x1xf32> to vector<10x10xf32>
    %320 = arith.mulf %315, %319 : vector<10x10xf32>
    %cst_99 = arith.constant dense<0.000000e+00> : vector<10x8xf32>
    %321 = tpu.matmul %320, %308, %cst_99 {dimension_numbers = #tpu.dot_dimension_numbers<[1], [0], [0], [1], [0, 0, 1, 1], [], []>} : vector<10x10xf32>, vector<10x8xf32>, vector<10x8xf32> -> vector<10x8xf32>
    %322 = vector.extract_strided_slice %273 {offsets = [0, 24], sizes = [10, 8], strides = [1, 1]} : vector<10x96xf32> to vector<10x8xf32>
    %323 = vector.extract_strided_slice %273 {offsets = [0, 56], sizes = [10, 8], strides = [1, 1]} : vector<10x96xf32> to vector<10x8xf32>
    %324 = vector.extract_strided_slice %273 {offsets = [0, 88], sizes = [10, 8], strides = [1, 1]} : vector<10x96xf32> to vector<10x8xf32>
    %cst_100 = arith.constant dense<0.000000e+00> : vector<10x10xf32>
    %325 = tpu.matmul %322, %323, %cst_100 {dimension_numbers = #tpu.dot_dimension_numbers<[1], [1], [0], [0], [0, 0, 1, 0], [], []>} : vector<10x8xf32>, vector<10x8xf32>, vector<10x10xf32> -> vector<10x10xf32>
    %326 = arith.addf %325, %46 : vector<10x10xf32>
    %cst_101 = arith.constant dense<0xFF800000> : vector<10xf32>
    %327 = vector.multi_reduction <maximumf>, %326, %cst_101 [1] : vector<10x10xf32> to vector<10xf32>
    %328 = vector.shape_cast %327 : vector<10xf32> to vector<10x1xf32>
    %329 = vector.broadcast %328 : vector<10x1xf32> to vector<10x10xf32>
    %330 = arith.subf %326, %329 : vector<10x10xf32>
    %331 = math.exp %330 : vector<10x10xf32>
    %cst_102 = arith.constant dense<0.000000e+00> : vector<10xf32>
    %332 = vector.multi_reduction <add>, %331, %cst_102 [1] : vector<10x10xf32> to vector<10xf32>
    %333 = vector.shape_cast %332 : vector<10xf32> to vector<10x1xf32>
    %334 = tpu.reciprocal %333 {approx = true} : vector<10x1xf32> -> vector<10x1xf32>
    %335 = vector.broadcast %334 : vector<10x1xf32> to vector<10x10xf32>
    %336 = arith.mulf %331, %335 : vector<10x10xf32>
    %cst_103 = arith.constant dense<0.000000e+00> : vector<10x8xf32>
    %337 = tpu.matmul %336, %324, %cst_103 {dimension_numbers = #tpu.dot_dimension_numbers<[1], [0], [0], [1], [0, 0, 1, 1], [], []>} : vector<10x10xf32>, vector<10x8xf32>, vector<10x8xf32> -> vector<10x8xf32>
    %338 = tpu.concatenate %289, %305, %321, %337 in 1 : vector<10x8xf32>, vector<10x8xf32>, vector<10x8xf32>, vector<10x8xf32> -> vector<10x32xf32>
    %339 = arith.truncf %338 : vector<10x32xf32> to vector<10x32xbf16>
    %c1_104 = arith.constant 1 : index
    %c0_105 = arith.constant 0 : index
    %c0_106 = arith.constant 0 : index
    %340 = vector.load %arg5[%c1_104, %c0_105, %c0_106] : memref<2x32x32xbf16, #tpu.memory_space<vmem>>, vector<1x32x32xbf16>
    %341 = vector.shape_cast %340 : vector<1x32x32xbf16> to vector<32x32xbf16>
    %cst_107 = arith.constant dense<0.000000e+00> : vector<10x32xf32>
    %342 = tpu.matmul %339, %341, %cst_107 {dimension_numbers = #tpu.dot_dimension_numbers<[1], [0], [0], [1], [0, 0, 1, 1], [], []>} : vector<10x32xbf16>, vector<32x32xbf16>, vector<10x32xf32> -> vector<10x32xf32>
    %343 = arith.addf %235, %342 : vector<10x32xf32>
    %344 = vector.broadcast %241 : vector<1x32xf32> to vector<10x32xf32>
    %345 = arith.addf %343, %344 : vector<10x32xf32>
    %cst_108 = arith.constant dense<0.000000e+00> : vector<10xf32>
    %346 = vector.multi_reduction <add>, %345, %cst_108 [1] : vector<10x32xf32> to vector<10xf32>
    %347 = vector.shape_cast %346 : vector<10xf32> to vector<10x1xf32>
    %cst_109 = arith.constant 3.200000e+01 : f32
    %348 = vector.broadcast %cst_109 : f32 to vector<10x1xf32>
    %349 = arith.divf %347, %348 : vector<10x1xf32>
    %350 = vector.broadcast %349 : vector<10x1xf32> to vector<10x32xf32>
    %351 = arith.subf %345, %350 : vector<10x32xf32>
    %352 = arith.mulf %351, %351 : vector<10x32xf32>
    %cst_110 = arith.constant dense<0.000000e+00> : vector<10xf32>
    %353 = vector.multi_reduction <add>, %352, %cst_110 [1] : vector<10x32xf32> to vector<10xf32>
    %354 = vector.shape_cast %353 : vector<10xf32> to vector<10x1xf32>
    %cst_111 = arith.constant 3.200000e+01 : f32
    %355 = vector.broadcast %cst_111 : f32 to vector<10x1xf32>
    %356 = arith.divf %354, %355 : vector<10x1xf32>
    %357 = vector.broadcast %349 : vector<10x1xf32> to vector<10x32xf32>
    %358 = arith.subf %345, %357 : vector<10x32xf32>
    %cst_112 = arith.constant 9.99999974E-6 : f32
    %359 = vector.broadcast %cst_112 : f32 to vector<10x1xf32>
    %360 = arith.addf %356, %359 : vector<10x1xf32>
    %361 = math.rsqrt %360 : vector<10x1xf32>
    %362 = vector.broadcast %361 : vector<10x1xf32> to vector<10x32xf32>
    %363 = arith.mulf %358, %362 : vector<10x32xf32>
    %364 = vector.broadcast %242 : vector<1x32xf32> to vector<10x32xf32>
    %365 = arith.mulf %363, %364 : vector<10x32xf32>
    %366 = vector.broadcast %243 : vector<1x32xf32> to vector<10x32xf32>
    %367 = arith.addf %365, %366 : vector<10x32xf32>
    %368 = arith.truncf %367 : vector<10x32xf32> to vector<10x32xbf16>
    %c1_113 = arith.constant 1 : index
    %c0_114 = arith.constant 0 : index
    %c0_115 = arith.constant 0 : index
    %369 = vector.load %arg6[%c1_113, %c0_114, %c0_115] : memref<2x32x64xbf16, #tpu.memory_space<vmem>>, vector<1x32x64xbf16>
    %370 = vector.shape_cast %369 : vector<1x32x64xbf16> to vector<32x64xbf16>
    %cst_116 = arith.constant dense<0.000000e+00> : vector<10x64xf32>
    %371 = tpu.matmul %368, %370, %cst_116 {dimension_numbers = #tpu.dot_dimension_numbers<[1], [0], [0], [1], [0, 0, 1, 1], [], []>} : vector<10x32xbf16>, vector<32x64xbf16>, vector<10x64xf32> -> vector<10x64xf32>
    %372 = vector.broadcast %244 : vector<1x64xf32> to vector<10x64xf32>
    %373 = arith.addf %371, %372 : vector<10x64xf32>
    %cst_117 = arith.constant 5.000000e-01 : f32
    %374 = vector.broadcast %cst_117 : f32 to vector<10x64xf32>
    %375 = arith.mulf %374, %373 : vector<10x64xf32>
    %cst_118 = arith.constant 0.707106769 : f32
    %376 = vector.broadcast %cst_118 : f32 to vector<10x64xf32>
    %377 = arith.mulf %373, %376 : vector<10x64xf32>
    %cst_119 = arith.constant 0.000000e+00 : f32
    %378 = vector.broadcast %cst_119 : f32 to vector<10x64xf32>
    %379 = arith.cmpf olt, %377, %378 : vector<10x64xf32>
    %cst_120 = arith.constant -1.000000e+00 : f32
    %cst_121 = arith.constant 1.000000e+00 : f32
    %380 = vector.broadcast %cst_120 : f32 to vector<10x64xf32>
    %381 = vector.broadcast %cst_121 : f32 to vector<10x64xf32>
    %382 = arith.select %379, %380, %381 : vector<10x64xi1>, vector<10x64xf32>
    %383 = math.absf %377 : vector<10x64xf32>
    %cst_122 = arith.constant 0.327591091 : f32
    %384 = vector.broadcast %cst_122 : f32 to vector<10x64xf32>
    %385 = arith.mulf %384, %383 : vector<10x64xf32>
    %cst_123 = arith.constant 1.000000e+00 : f32
    %386 = vector.broadcast %cst_123 : f32 to vector<10x64xf32>
    %387 = arith.addf %386, %385 : vector<10x64xf32>
    %388 = tpu.reciprocal %387 {approx = true} : vector<10x64xf32> -> vector<10x64xf32>
    %389 = arith.mulf %387, %388 : vector<10x64xf32>
    %cst_124 = arith.constant 2.000000e+00 : f32
    %390 = vector.broadcast %cst_124 : f32 to vector<10x64xf32>
    %391 = arith.subf %390, %389 : vector<10x64xf32>
    %392 = arith.mulf %388, %391 : vector<10x64xf32>
    %cst_125 = arith.constant 1.06140542 : f32
    %393 = vector.broadcast %cst_125 : f32 to vector<10x64xf32>
    %394 = arith.mulf %393, %392 : vector<10x64xf32>
    %cst_126 = arith.constant -1.45315206 : f32
    %395 = vector.broadcast %cst_126 : f32 to vector<10x64xf32>
    %396 = arith.addf %394, %395 : vector<10x64xf32>
    %397 = arith.mulf %396, %392 : vector<10x64xf32>
    %cst_127 = arith.constant 1.42141378 : f32
    %398 = vector.broadcast %cst_127 : f32 to vector<10x64xf32>
    %399 = arith.addf %397, %398 : vector<10x64xf32>
    %400 = arith.mulf %399, %392 : vector<10x64xf32>
    %cst_128 = arith.constant -0.284496725 : f32
    %401 = vector.broadcast %cst_128 : f32 to vector<10x64xf32>
    %402 = arith.addf %400, %401 : vector<10x64xf32>
    %403 = arith.mulf %402, %392 : vector<10x64xf32>
    %cst_129 = arith.constant 0.254829586 : f32
    %404 = vector.broadcast %cst_129 : f32 to vector<10x64xf32>
    %405 = arith.addf %403, %404 : vector<10x64xf32>
    %406 = arith.mulf %405, %392 : vector<10x64xf32>
    %cst_130 = arith.constant 0.000000e+00 : f32
    %407 = vector.broadcast %cst_130 : f32 to vector<10x64xf32>
    %408 = arith.subf %407, %383 : vector<10x64xf32>
    %409 = arith.mulf %408, %383 : vector<10x64xf32>
    %410 = math.exp %409 : vector<10x64xf32>
    %411 = arith.mulf %406, %410 : vector<10x64xf32>
    %cst_131 = arith.constant 1.000000e+00 : f32
    %412 = vector.broadcast %cst_131 : f32 to vector<10x64xf32>
    %413 = arith.subf %412, %411 : vector<10x64xf32>
    %414 = arith.mulf %382, %413 : vector<10x64xf32>
    %cst_132 = arith.constant 1.000000e+00 : f32
    %415 = vector.broadcast %cst_132 : f32 to vector<10x64xf32>
    %416 = arith.addf %415, %414 : vector<10x64xf32>
    %417 = arith.mulf %375, %416 : vector<10x64xf32>
    %418 = arith.truncf %417 : vector<10x64xf32> to vector<10x64xbf16>
    %c1_133 = arith.constant 1 : index
    %c0_134 = arith.constant 0 : index
    %c0_135 = arith.constant 0 : index
    %419 = vector.load %arg7[%c1_133, %c0_134, %c0_135] : memref<2x64x32xbf16, #tpu.memory_space<vmem>>, vector<1x64x32xbf16>
    %420 = vector.shape_cast %419 : vector<1x64x32xbf16> to vector<64x32xbf16>
    %cst_136 = arith.constant dense<0.000000e+00> : vector<10x32xf32>
    %421 = tpu.matmul %418, %420, %cst_136 {dimension_numbers = #tpu.dot_dimension_numbers<[1], [0], [0], [1], [0, 0, 1, 1], [], []>} : vector<10x64xbf16>, vector<64x32xbf16>, vector<10x32xf32> -> vector<10x32xf32>
    %422 = arith.addf %345, %421 : vector<10x32xf32>
    %423 = vector.broadcast %245 : vector<1x32xf32> to vector<10x32xf32>
    %424 = arith.addf %422, %423 : vector<10x32xf32>
    %cst_137 = arith.constant dense<0.000000e+00> : vector<10xf32>
    %425 = vector.multi_reduction <add>, %424, %cst_137 [1] : vector<10x32xf32> to vector<10xf32>
    %426 = vector.shape_cast %425 : vector<10xf32> to vector<10x1xf32>
    %cst_138 = arith.constant 3.200000e+01 : f32
    %427 = vector.broadcast %cst_138 : f32 to vector<10x1xf32>
    %428 = arith.divf %426, %427 : vector<10x1xf32>
    %429 = vector.broadcast %428 : vector<10x1xf32> to vector<10x32xf32>
    %430 = arith.subf %424, %429 : vector<10x32xf32>
    %431 = arith.mulf %430, %430 : vector<10x32xf32>
    %cst_139 = arith.constant dense<0.000000e+00> : vector<10xf32>
    %432 = vector.multi_reduction <add>, %431, %cst_139 [1] : vector<10x32xf32> to vector<10xf32>
    %433 = vector.shape_cast %432 : vector<10xf32> to vector<10x1xf32>
    %cst_140 = arith.constant 3.200000e+01 : f32
    %434 = vector.broadcast %cst_140 : f32 to vector<10x1xf32>
    %435 = arith.divf %433, %434 : vector<10x1xf32>
    %436 = vector.broadcast %428 : vector<10x1xf32> to vector<10x32xf32>
    %437 = arith.subf %424, %436 : vector<10x32xf32>
    %cst_141 = arith.constant 9.99999974E-6 : f32
    %438 = vector.broadcast %cst_141 : f32 to vector<10x1xf32>
    %439 = arith.addf %435, %438 : vector<10x1xf32>
    %440 = math.rsqrt %439 : vector<10x1xf32>
    %441 = vector.broadcast %440 : vector<10x1xf32> to vector<10x32xf32>
    %442 = arith.mulf %437, %441 : vector<10x32xf32>
    %443 = vector.broadcast %3 : vector<1x32xf32> to vector<10x32xf32>
    %444 = arith.mulf %442, %443 : vector<10x32xf32>
    %445 = vector.broadcast %4 : vector<1x32xf32> to vector<10x32xf32>
    %446 = arith.addf %444, %445 : vector<10x32xf32>
    %447 = vector.extract_strided_slice %446 {offsets = [0, 0], sizes = [5, 32], strides = [1, 1]} : vector<10x32xf32> to vector<5x32xf32>
    %cst_142 = arith.constant dense<0.000000e+00> : vector<32xf32>
    %448 = vector.multi_reduction <add>, %447, %cst_142 [0] : vector<5x32xf32> to vector<32xf32>
    %449 = vector.shape_cast %448 : vector<32xf32> to vector<1x32xf32>
    %cst_143 = arith.constant 5.000000e+00 : f32
    %450 = vector.broadcast %cst_143 : f32 to vector<1x32xf32>
    %451 = arith.divf %449, %450 : vector<1x32xf32>
    %452 = vector.extract_strided_slice %446 {offsets = [5, 0], sizes = [5, 32], strides = [1, 1]} : vector<10x32xf32> to vector<5x32xf32>
    %cst_144 = arith.constant dense<0.000000e+00> : vector<32xf32>
    %453 = vector.multi_reduction <add>, %452, %cst_144 [0] : vector<5x32xf32> to vector<32xf32>
    %454 = vector.shape_cast %453 : vector<32xf32> to vector<1x32xf32>
    %cst_145 = arith.constant 5.000000e+00 : f32
    %455 = vector.broadcast %cst_145 : f32 to vector<1x32xf32>
    %456 = arith.divf %454, %455 : vector<1x32xf32>
    %457 = tpu.concatenate %451, %456 in 0 : vector<1x32xf32>, vector<1x32xf32> -> vector<2x32xf32>
    %458 = arith.truncf %457 : vector<2x32xf32> to vector<2x32xbf16>
    %c0_146 = arith.constant 0 : index
    %c0_147 = arith.constant 0 : index
    %459 = vector.load %arg8[%c0_146, %c0_147] : memref<32x128xbf16, #tpu.memory_space<vmem>>, vector<32x128xbf16>
    %cst_148 = arith.constant dense<0.000000e+00> : vector<2x128xf32>
    %460 = tpu.matmul %458, %459, %cst_148 {dimension_numbers = #tpu.dot_dimension_numbers<[1], [0], [0], [1], [0, 0, 1, 1], [], []>} : vector<2x32xbf16>, vector<32x128xbf16>, vector<2x128xf32> -> vector<2x128xf32>
    %c0_149 = arith.constant 0 : index
    %c0_150 = arith.constant 0 : index
    %461 = vector.load %arg9[%c0_149, %c0_150] : memref<1x128xf32, #tpu.memory_space<vmem>>, vector<1x128xf32>
    %462 = vector.broadcast %461 : vector<1x128xf32> to vector<2x128xf32>
    %463 = arith.addf %460, %462 : vector<2x128xf32>
    %c0_151 = arith.constant 0 : index
    %c0_152 = arith.constant 0 : index
    %464 = vector.load %arg10[%c0_151, %c0_152] : memref<2x128xf32, #tpu.memory_space<vmem>>, vector<2x128xf32>
    tpu.vector_store %arg10[%c0_151, %c0_152], %463 {strides = array<i32>} : memref<2x128xf32, #tpu.memory_space<vmem>>, vector<2x128xf32>,
    return
  }
}

</mosaic_0001>

<bundles_post_ra>
// kernel: blip_finetuner_forward.1
= control target key start
LH: loop header
LB: loop body
LE: loop exit
PB: predicated region body
PF: predicated region fallthrough
CT: control target
= control target key end

     0   :  { %s2879_s0 = inlined_call_operand.vmem [shape: f32[8,192], index: 0, kind: input, shape index: {}]   ;;  %s2880_s1 = inlined_call_operand.vmem [shape: bf16[192,32], index: 1, kind: input, shape index: {}]   ;;  %s2881_s2 = inlined_call_operand.vmem [shape: f32[9,32], index: 2, kind: input, shape index: {}]   ;;  %s2882_s3 = inlined_call_operand.vmem [shape: f32[2,8,128], index: 3, kind: input, shape index: {}]   ;;  %s2883_s4 = inlined_call_operand.vmem [shape: bf16[2,32,96], index: 4, kind: input, shape index: {}]   ;;  %s2884_s5 = inlined_call_operand.vmem [shape: bf16[2,32,32], index: 5, kind: input, shape index: {}]   ;;  %s2885_s6 = inlined_call_operand.vmem [shape: bf16[2,32,64], index: 6, kind: input, shape index: {}]   ;;  %s2886_s7 = inlined_call_operand.vmem [shape: bf16[2,64,32], index: 7, kind: input, shape index: {}]   ;;  %s2887_s8 = inlined_call_operand.vmem [shape: bf16[32,128], index: 8, kind: input, shape index: {}]   ;;  %s2888_s9 = inlined_call_operand.vmem [shape: f32[1,128], index: 9, kind: input, shape index: {}]   ;;  %s2889_s10 = inlined_call_operand.hbm [shape: f32[2,128], index: 10, kind: output, shape index: {}]  }
   0x1   :  { %v2091_v0 = vld [vmem:[%s2880_s1 + $0x38] sm:$0xff]  ;;  %v2090_v2 = vld [vmem:[%s2880_s1 + $0x30] sm:$0xff]  ;;  %v2089_v4 = vld [vmem:[%s2880_s1 + $0x28] sm:$0xff] }
   0x2   :  { %v2095_v1 = vld [vmem:[%s2880_s1 + $0x58] sm:$0xff]  ;;  %147 = vmatpush.bf16.msra.mxu0 %v2091_v0  ;;  %v2094_v3 = vld [vmem:[%s2880_s1 + $0x50] sm:$0xff] }
   0x3   :  { %164 = vmatpush.bf16.msra.mxu1 %v2095_v1 }
   0x6   :  { %148 = vmatpush.bf16.msra.mxu0 %v2090_v2 }
   0x7   :  { %15 = vsyncpa [#allocation3], 0  ;;  %165 = vmatpush.bf16.msra.mxu1 %v2094_v3  ;;  %v2093_v5 = vld [vmem:[%s2880_s1 + $0x48] sm:$0xff]  ;;  %v2088_v6 = vld [vmem:[%s2880_s1 + $0x20] sm:$0xff]  ;;  %vm143_vm0 = vcmask 523264   ;;  %vm2890_vm1 = vcmask 1040384  }
   0x8   :  { %v2092_v7 = vld [vmem:[%s2880_s1 + $0x40] sm:$0xff]  ;;  %v43_v8 = vld [vmem:[%s2879_s0 + $0x8] sm:$0xff]  ;;  %v2087_v9 = vld [vmem:[%s2880_s1 + $0x18] sm:$0xff]  ;;  %vm192_vm2 = vcmask 1044480   ;;  %vm194_vm3 = vcmask 1045504   ;;  %vm228_vm4 = vcmask 261120  }
   0x9   :  { %v45_v10 = vpack.c.bf16 %v43_v8, %v43_v8  ;;  %v2086_v11 = vld [vmem:[%s2880_s1 + $0x10] sm:$0xff]  ;;  %v2085_v12 = vld [vmem:[%s2880_s1 + $0x8] sm:$0xff]  ;;  %v2084_v13 = vld [vmem:[%s2880_s1] sm:$0xff]  ;;  %vm232_vm5 = vcmask 254976   ;;  %v2301_v38 = vmov 32.0   ;;  %s2302_s11 = smov 64  }
   0xa   :  { %149 = vmatpush.bf16.msra.mxu0 %v2089_v4  ;;  %v42_v14 = vld [vmem:[%s2879_s0] sm:$0xff]  ;;  %2171 = vrcp.f32 %v2301_v38  ;;  %v2097_v55 = vld [vmem:[%s2883_s4 + $0x8] sm:$0xff]  ;;  %s2303_s12 = smov 96   ;;  %s2304_s13 = smov 120   ;;  %vm328_vm13 = vcmask 64512  }
   0xb   :  { %166 = vmatpush.bf16.msra.mxu1 %v2093_v5  ;;  %v44_v15 = vpack.c.bf16 %v42_v14, %v42_v14  ;;  %v2167_v18 = vld [vmem:[%s2881_s2 + $0x5] ss:$0 sm:$0xff]  ;;  %v37_v19 = vld [vmem:[%s2881_s2] sm:$0x1f]  ;;  %v39_v20 = vld [vmem:[%s2881_s2 + $0x6] sm:$0x1]  ;;  %314 = vmatpush.bf16.msra.mxu2 %v2097_v55 }
   0xc   :  { %v175_v23 = vrot.slane %v37_v19, 1  ;;  %v178_v24 = vrot.slane %v37_v19, 5  ;;  %v173_v25 = vadd.f32 %v39_v20, %v37_v19  ;;  %v2096_v57 = vld [vmem:[%s2883_s4] sm:$0xff]  ;;  %s2305_s14 = smov 80   ;;  %s2307_s15 = smov 88  }
   0xd   :  { %s2308_s16 = smov 72   ;;  %s2309_s17 = smov 112  }
   0xe   :  { %150 = vmatpush.bf16.msra.mxu0 %v2088_v6  ;;  %v185_v29 = vrot.slane %v173_v25, 3  ;;  %s2310_s18 = smov 104   ;;  %s2311_s19 = smov 56  }
   0xf   :  { %167 = vmatpush.bf16.msra.mxu1 %v2092_v7  ;;  %315 = vmatpush.bf16.msra.mxu2 %v2096_v57  ;;  %s2312_s20 = smov 48   ;;  %s2313_s21 = smov 40  }
  0x10   :  { %v2172_v39 = vpop.eup %2171  ;;  %s2314_s22 = smov 8   ;;  %s2315_s23 = smov 16  }
  0x11   :  { %v237_v40 = vmul.f32 32.0, %v2172_v39  ;;  %vm241_vm6 = vweird.f32 %v2172_v39  ;;  %s2316_s24 = smov 24   ;;  %s2319_s1 = smov [#allocation2]  }
  0x12   :  { %151 = vmatpush.bf16.msra.mxu0 %v2087_v9  ;;  %1909 = vmatmul.msk.bf16.vlgmr.msra.gmra.mxu1 %vm143_vm0, %v45_v10  ;;  %v2456_v10 = vld [vmem:[%s2882_s3] sm:$0xff] }
  0x13   :  { %v238_v41 = vsub.f32 1.0, %v237_v40 }
  0x15   :  { %v239_v42 = vmul.f32 %v2172_v39, %v238_v41 }
  0x16   :  { %152 = vmatpush.bf16.msra.mxu0 %v2086_v11 }
  0x17   :  { %v240_v43 = vadd.f32 %v2172_v39, %v239_v42 }
  0x19   :  { %v2437_v44 = vsel %vm241_vm6, %v2172_v39, %v240_v43 }
  0x1a   :  { %153 = vmatpush.bf16.msra.mxu0 %v2085_v12 }
  0x1e   :  { %154 = vmatpush.bf16.msra.mxu0 %v2084_v13  ;;  %v281_v13 = vperm.slane %v2456_v10, 0 }
  0x21   :  { %155 = vmatmul.bf16.vlgmr.msra.gmra.mxu0 %v44_v15 }
  0x8f   :  { %v169_v16 = vpop.f32.mrf.mxu1 }
  0x97   :  { %v171_v17 = vpop.f32.mrf.mxu1 }
  0x9e   :  { %v156_v21 = vpop.f32.mrf.mxu0 }
  0x9f   :  { %v157_v22 = vadd.f32 %v2167_v18, %v156_v21  ;;  %v284_v18 = vperm.slane %v2456_v10, 1 }
  0xa1   :  { %v170_v26 = vadd.f32 %v169_v16, %v157_v22 }
  0xa3   :  { %v177_v27 = vadd.f32 %v175_v23, %v170_v26  ;;  %v180_v28 = vadd.f32 %v178_v24, %v170_v26  ;;  %v292_v23 = vperm.slane %v2456_v10, 2 }
  0xa5   :  { %v182_v30 = vrot.slane %v177_v27, 7  ;;  %v2427_v32 = vrot.slane %v180_v28, 6 }
  0xa6   :  { %v158_v31 = vpop.f32.mrf.mxu0 }
  0xa7   :  { %v191_v33 = vsel %vm2890_vm1, %v173_v25, %v182_v30  ;;  %v233_v37 = vsel %vm232_vm5, %v2427_v32, 0.0  ;;  %v196_v30 = vlaneseq }
  0xa8   :  { %v193_v34 = vsel %vm192_vm2, %v191_v33, %v185_v29 }
  0xa9   :  { %v2431_v35 = vsel %vm194_vm3, %v193_v34, %v2427_v32  ;;  %v200_v31 = vand.u32 127, %v196_v30  ;;  %v197_v33 = vshrl.u32 %v196_v30, 7 }
  0xaa   :  { %v229_v36 = vsel %vm228_vm4, %v2431_v35, 0.0 }
  0xab   :  { %230 = vadd.xlane.f32.xlu0 %v229_v36  ;;  %vm218_vm14 = vcmp.ge.s32.totalorder %v200_v31, 5  ;;  %vm219_vm15 = vcmp.lt.s32.totalorder %v200_v31, 10  ;;  %vm203_vm2 = vcmp.lt.s32.totalorder %v197_v33, 5  ;;  %vm208_vm3 = vcmp.lt.s32.totalorder %v200_v31, 5 }
  0xac   :  { %vm212_vm6 = vcmp.ge.s32.totalorder %v197_v33, 5  ;;  %v198_v34 = vadd.s32 8, %v197_v33  ;;  %v2306_v36 = vmov -1e+30  }
  0xb3   :  { %234 = vadd.xlane.f32.xlu0 %v233_v37 }
 0x11e   :  { %v231_v45 = vpop.xlane.xlu0 %230 }
 0x11f   :  { %v243_v46 = vmul.f32 %v2437_v44, %v231_v45 }
 0x121   :  { %v245_v47 = vsub.f32 %v2431_v35, %v243_v46 }
 0x123   :  { %v247_v48 = vmul.f32 %v245_v47, %v245_v47 }
 0x125   :  { %v249_v49 = vsel %vm228_vm4, %v247_v48, 0.0 }
 0x126   :  { %250 = vadd.xlane.f32.xlu1 %v249_v49  ;;  %v235_v50 = vpop.xlane.xlu0 %234 }
 0x127   :  { %v244_v51 = vmul.f32 %v2437_v44, %v235_v50 }
 0x129   :  { %v246_v52 = vsub.f32 %v2427_v32, %v244_v51 }
 0x12b   :  { %v248_v53 = vmul.f32 %v246_v52, %v246_v52 }
 0x12d   :  { %v252_v54 = vsel %vm232_vm5, %v248_v53, 0.0 }
 0x12e   :  { %253 = vadd.xlane.f32.xlu1 %v252_v54 }
 0x199   :  { %v251_v56 = vpop.xlane.xlu1 %250 }
 0x19a   :  { %v255_v58 = vmul.f32 %v251_v56, %v2437_v44 }
 0x19c   :  { %v257_v59 = vadd.f32 1e-05, %v255_v58 }
 0x19e   :  { %2173 = vrsqrt.f32 %v257_v59  ;;  %vm265_vm8 = vweird.f32 %v257_v59 }
 0x1a1   :  { %v254_v60 = vpop.xlane.xlu1 %253 }
 0x1a2   :  { %v256_v61 = vmul.f32 %v254_v60, %v2437_v44 }
 0x1a4   :  { %v2174_v62 = vpop.eup %2173  ;;  %v258_v63 = vadd.f32 1e-05, %v256_v61 }
 0x1a5   :  { %v260_v0 = vmul.f32 %v2174_v62, %v257_v59  ;;  %vm266_vm7 = vweird.f32 %v2174_v62 }
 0x1a6   :  { %2175 = vrsqrt.f32 %v258_v63  ;;  %vm267_vm9 = vmor %vm265_vm8, %vm266_vm7  ;;  %vm275_vm11 = vweird.f32 %v258_v63 }
 0x1a7   :  { %v261_v1 = vmul.f32 %v2174_v62, %v260_v0  ;;  %vm220_vm7 = vmand %vm218_vm14, %vm219_vm15  ;;  %vm364_vm14 = vcmask 74752   ;;  %vm738_vm15 = vcmask 130048  }
 0x1a8   :  { %vm210_vm8 = vmand %vm203_vm2, %vm208_vm3  ;;  %vm741_vm2 = vcmask 195584  }
 0x1a9   :  { %v262_v2 = vmul.f32 0.5, %v261_v1 }
 0x1ab   :  { %v263_v3 = vsub.f32 1.5, %v262_v2 }
 0x1ac   :  { %v2176_v4 = vpop.eup %2175 }
 0x1ad   :  { %v264_v5 = vmul.f32 %v2174_v62, %v263_v3  ;;  %v270_v6 = vmul.f32 %v2176_v4, %v258_v63  ;;  %vm276_vm10 = vweird.f32 %v2176_v4 }
 0x1ae   :  { %vm277_vm12 = vmor %vm275_vm11, %vm276_vm10  ;;  %vm360_vm11 = vcmask 80896  }
 0x1af   :  { %v271_v7 = vmul.f32 %v2176_v4, %v270_v6  ;;  %v268_v8 = vsel %vm267_vm9, %v2174_v62, %v264_v5  ;;  %vm221_vm9 = vmand %vm212_vm6, %vm220_vm7 }
 0x1b0   :  { %v279_v12 = vmul.f32 %v268_v8, %v245_v47  ;;  %vm223_vm10 = vmor %vm210_vm8, %vm221_vm9 }
 0x1b1   :  { %v272_v9 = vmul.f32 0.5, %v271_v7  ;;  %v2484_v37 = vsel %vm223_vm10, 0.0, %v2306_v36 }
 0x1b2   :  { %v282_v17 = vmul.f32 %v281_v13, %v279_v12 }
 0x1b3   :  { %v273_v11 = vsub.f32 1.5, %v272_v9 }
 0x1b4   :  { %v285_v20 = vadd.f32 %v284_v18, %v282_v17 }
 0x1b5   :  { %v274_v14 = vmul.f32 %v2176_v4, %v273_v11 }
 0x1b7   :  { %v278_v15 = vsel %vm277_vm12, %v2176_v4, %v274_v14  ;;  %vm215_vm12 = vcmp.lt.s32.totalorder %v198_v34, 10 }
 0x1b8   :  { %v280_v16 = vmul.f32 %v278_v15, %v246_v52  ;;  %vm222_vm1 = vmand %vm215_vm12, %vm220_vm7 }
 0x1b9   :  { %v2488_v41 = vsel %vm222_vm1, 0.0, %v2306_v36  ;;  %vm395_vm1 = vcmask 1041408  }
 0x1ba   :  { %v283_v19 = vmul.f32 %v281_v13, %v280_v16 }
 0x1bc   :  { %v286_v21 = vadd.f32 %v284_v18, %v283_v19 }
 0x1be   :  { %v287_v22 = vpack.c.bf16 %v286_v21, %v285_v20 }
 0x1c0   :  { %1918 = vmatmul.msk.bf16.vlgmr.msra.gmra.mxu2 %vm228_vm4, %v287_v22 }
 0x243   :  { %v317_v24 = vpop.f32.mrf.mxu2 }
 0x244   :  { %v2462_v25 = vadd.f32 %v317_v24, %v292_v23 }
 0x246   :  { %384 = vrot.lane.b32.xlu1 %v2462_v25, %s2302_s11 }
 0x24b   :  { %v319_v26 = vpop.f32.mrf.mxu2 }
 0x24c   :  { %v2466_v27 = vadd.f32 %v319_v26, %v292_v23 }
 0x24e   :  { %326 = vrot.lane.b32.xlu2 %v2466_v27, %s2303_s12  ;;  %421 = vrot.lane.b32.xlu1 %v2462_v25, %s2304_s13 }
 0x256   :  { %423 = vrot.lane.b32.xlu1 %v2466_v27, %s2304_s13  ;;  %324 = vrot.lane.b32.xlu2 %v2462_v25, %s2303_s12 }
 0x25e   :  { %524 = vrot.lane.b32.xlu2 %v2466_v27, %s2305_s14 }
 0x2a8   :  { %v327_v28 = vpop.permute.xlu2 %326 }
 0x2a9   :  { %1919 = vmatpush.xpose.msk.msra.mxu3 %vm328_vm13, %v327_v28 }
 0x2b0   :  { %v325_v29 = vpop.permute.xlu2 %324 }
 0x2b1   :  { %1920 = vmatpush.xpose.msk.msra.mxu3 %vm328_vm13, %v325_v29 }
 0x2b4   :  { %1921 = vmatmul.msk.f32.vlgmr.msra.gmra.mxu3 %vm328_vm13, %v2462_v25 }
 0x2b8   :  { %v385_v46 = vpop.permute.xlu1 %384  ;;  %v525_v60 = vpop.permute.xlu2 %524 }
 0x2bc   :  { %1922 = vmatmul.msk.f32.gmra.mxu3 %vm328_vm13, %v2466_v27 }
 0x2c0   :  { %v422_v47 = vpop.permute.xlu1 %421 }
 0x2c8   :  { %v424_v48 = vpop.permute.xlu1 %423 }
 0x337   :  { %v354_v38 = vpop.f32.mrf.mxu3 }
 0x338   :  { %v355_v39 = vadd.f32 %v354_v38, %v2484_v37 }
 0x33a   :  { %v361_v40 = vsel %vm360_vm11, %v355_v39, -inf }
 0x33b   :  { %362 = vmax.xlane.f32.xlu0 %v361_v40 }
 0x33f   :  { %v357_v42 = vpop.f32.mrf.mxu3 }
 0x340   :  { %v358_v43 = vadd.f32 %v357_v42, %v2488_v41 }
 0x342   :  { %v365_v45 = vsel %vm364_vm14, %v358_v43, -inf }
 0x343   :  { %366 = vmax.xlane.f32.xlu1 %v365_v45 }
 0x34f   :  { %386 = vrot.lane.b32.xlu0 %v2466_v27, %s2302_s11 }
 0x357   :  { %427 = vrot.lane.b32.xlu0 %v2466_v27, %s2307_s15 }
 0x35c   :  { %621 = vrot.lane.b32.xlu1 %v2466_v27, %s2308_s16 }
 0x35f   :  { %425 = vrot.lane.b32.xlu0 %v2462_v25, %s2307_s15 }
 0x367   :  { %522 = vrot.lane.b32.xlu0 %v2462_v25, %s2305_s14 }
 0x36f   :  { %518 = vrot.lane.b32.xlu0 %v2462_v25, %s2309_s17 }
 0x377   :  { %520 = vrot.lane.b32.xlu0 %v2466_v27, %s2309_s17 }
 0x37f   :  { %617 = vrot.lane.b32.xlu0 %v2466_v27, %s2310_s18 }
 0x3ae   :  { %v363_v49 = vpop.xlane.xlu0 %362 }
 0x3af   :  { %v368_v50 = vsub.f32 %v355_v39, %v363_v49 }
 0x3b1   :  { %v370_v51 = vmul.f32 1.442695, %v368_v50 }
 0x3b3   :  { %2177 = vpow2.f32 %v370_v51 }
 0x3b6   :  { %v367_v52 = vpop.xlane.xlu1 %366 }
 0x3b7   :  { %v369_v53 = vsub.f32 %v358_v43, %v367_v52 }
 0x3b9   :  { %v2178_v54 = vpop.eup %2177  ;;  %v372_v55 = vmul.f32 1.442695, %v369_v53 }
 0x3ba   :  { %v374_v56 = vsel %vm360_vm11, %v2178_v54, 0.0 }
 0x3bb   :  { %2179 = vpow2.f32 %v372_v55  ;;  %375 = vadd.xlane.f32.xlu2 %v374_v56 }
 0x3c1   :  { %v2180_v57 = vpop.eup %2179  ;;  %v387_v58 = vpop.permute.xlu0 %386 }
 0x3c2   :  { %1923 = vmatpush.msk.msrb.mxu2 %vm395_vm1, %v387_v58  ;;  %v377_v59 = vsel %vm364_vm14, %v2180_v57, 0.0 }
 0x3c3   :  { %378 = vadd.xlane.f32.xlu1 %v377_v59 }
 0x3c4   :  { %413 = vmatpush.msrb.mxu2 %v385_v46 }
 0x3c6   :  { %1933 = vmatpush.xpose.msk.msra.mxu2 %vm328_vm13, %v525_v60 }
 0x3c9   :  { %v428_v61 = vpop.permute.xlu0 %427 }
 0x3ca   :  { %1926 = vmatpush.xpose.msk.msrb.mxu3 %vm328_vm13, %v428_v61 }
 0x3ce   :  { %v622_v62 = vpop.permute.xlu1 %621 }
 0x3cf   :  { %1940 = vmatpush.xpose.msk.msrb.mxu0 %vm328_vm13, %v622_v62 }
 0x3d1   :  { %v426_v63 = vpop.permute.xlu0 %425 }
 0x3d2   :  { %1927 = vmatpush.xpose.msk.msrb.mxu3 %vm328_vm13, %v426_v63 }
 0x3d3   :  { %615 = vrot.lane.b32.xlu2 %v2462_v25, %s2310_s18 }
 0x3d5   :  { %1928 = vmatmul.msk.f32.vlgmr.msrb.gmra.mxu3 %vm328_vm13, %v422_v47 }
 0x3d9   :  { %v523_v0 = vpop.permute.xlu0 %522 }
 0x3da   :  { %1934 = vmatpush.xpose.msk.msra.mxu2 %vm328_vm13, %v523_v0 }
 0x3dc   :  { %619 = vrot.lane.b32.xlu1 %v2462_v25, %s2308_s16 }
 0x3dd   :  { %1929 = vmatmul.msk.f32.gmra.mxu3 %vm328_vm13, %v424_v48 }
 0x3e1   :  { %v519_v7 = vpop.permute.xlu0 %518 }
 0x3e9   :  { %v521_v9 = vpop.permute.xlu0 %520 }
 0x3f1   :  { %v618_v13 = vpop.permute.xlu0 %617 }
 0x42e   :  { %v376_v1 = vpop.xlane.xlu2 %375 }
 0x42f   :  { %2181 = vrcp.f32 %v376_v1 }
 0x435   :  { %v2182_v2 = vpop.eup %2181 }
 0x436   :  { %v379_v3 = vpop.xlane.xlu1 %378  ;;  %v382_v4 = vmul.f32 %v2182_v2, %v2178_v54  ;;  %v616_v11 = vpop.permute.xlu2 %615 }
 0x437   :  { %2183 = vrcp.f32 %v379_v3 }
 0x438   :  { %1924 = vmatmul.msk.f32.vlgmr.msrb.gmra.mxu2 %vm360_vm11, %v382_v4 }
 0x43d   :  { %v2184_v5 = vpop.eup %2183 }
 0x43e   :  { %v383_v6 = vmul.f32 %v2184_v5, %v2180_v57 }
 0x440   :  { %1925 = vmatmul.msk.f32.gmra.mxu2 %vm360_vm11, %v383_v6 }
 0x448   :  { %1935 = vmatmul.msk.f32.vlgmr.msra.gmra.mxu2 %vm328_vm13, %v519_v7 }
 0x44e   :  { %v620_v8 = vpop.permute.xlu1 %619 }
 0x44f   :  { %1941 = vmatpush.xpose.msk.msrb.mxu0 %vm328_vm13, %v620_v8 }
 0x450   :  { %1936 = vmatmul.msk.f32.gmra.mxu2 %vm328_vm13, %v521_v9 }
 0x452   :  { %1942 = vmatmul.msk.f32.vlgmr.msrb.gmra.mxu0 %vm328_vm13, %v616_v11 }
 0x458   :  { %v454_v12 = vpop.f32.mrf.mxu3 }
 0x459   :  { %v455_v14 = vadd.f32 %v454_v12, %v2484_v37 }
 0x45a   :  { %1943 = vmatmul.msk.f32.gmra.mxu0 %vm328_vm13, %v618_v13 }
 0x45b   :  { %v460_v15 = vsel %vm360_vm11, %v455_v14, -inf }
 0x45c   :  { %461 = vmax.xlane.f32.xlu1 %v460_v15 }
 0x460   :  { %v457_v16 = vpop.f32.mrf.mxu3 }
 0x461   :  { %v458_v17 = vadd.f32 %v457_v16, %v2488_v41 }
 0x463   :  { %v463_v18 = vsel %vm364_vm14, %v458_v17, -inf }
 0x464   :  { %464 = vmax.xlane.f32.xlu2 %v463_v18 }
 0x4bb   :  { %v2533_v19 = vpop.f32.mrf.mxu2 }
 0x4c3   :  { %v2535_v20 = vpop.f32.mrf.mxu2 }
 0x4cb   :  { %v551_v21 = vpop.f32.mrf.mxu2 }
 0x4cc   :  { %v552_v46 = vadd.f32 %v551_v21, %v2484_v37 }
 0x4ce   :  { %v557_v47 = vsel %vm360_vm11, %v552_v46, -inf }
 0x4cf   :  { %v462_v22 = vpop.xlane.xlu1 %461  ;;  %v648_v23 = vpop.f32.mrf.mxu0 }
 0x4d0   :  { %v466_v24 = vsub.f32 %v455_v14, %v462_v22  ;;  %v649_v26 = vadd.f32 %v648_v23, %v2484_v37 }
 0x4d2   :  { %v468_v28 = vmul.f32 1.442695, %v466_v24  ;;  %v654_v29 = vsel %vm360_vm11, %v649_v26, -inf }
 0x4d3   :  { %v554_v30 = vpop.f32.mrf.mxu2  ;;  %655 = vmax.xlane.f32.xlu2 %v654_v29 }
 0x4d4   :  { %2185 = vpow2.f32 %v468_v28  ;;  %v555_v31 = vadd.f32 %v554_v30, %v2488_v41 }
 0x4d6   :  { %v560_v33 = vsel %vm364_vm14, %v555_v31, -inf }
 0x4d7   :  { %561 = vmax.xlane.f32.xlu1 %v560_v33  ;;  %v651_v34 = vpop.f32.mrf.mxu0  ;;  %v465_v36 = vpop.xlane.xlu2 %464 }
 0x4d8   :  { %v2542_v38 = vadd.f32 %v651_v34, %v2488_v41  ;;  %v467_v39 = vsub.f32 %v458_v17, %v465_v36 }
 0x4da   :  { %v2186_v40 = vpop.eup %2185  ;;  %v657_v42 = vsel %vm364_vm14, %v2542_v38, -inf  ;;  %v470_v45 = vmul.f32 1.442695, %v467_v39 }
 0x4db   :  { %658 = vmax.xlane.f32.xlu0 %v657_v42  ;;  %v472_v43 = vsel %vm360_vm11, %v2186_v40, 0.0 }
 0x4dc   :  { %473 = vadd.xlane.f32.xlu2 %v472_v43  ;;  %2187 = vpow2.f32 %v470_v45 }
 0x4e2   :  { %v2188_v48 = vpop.eup %2187 }
 0x4e3   :  { %558 = vmax.xlane.f32.xlu0 %v557_v47  ;;  %v475_v49 = vsel %vm364_vm14, %v2188_v48, 0.0  ;;  %v2099_v47 = vld [vmem:[%s2884_s5 + $0x8] sm:$0xff] }
 0x4e4   :  { %770 = vmatpush.bf16.msrb.mxu2 %v2099_v47 }
 0x4eb   :  { %476 = vadd.xlane.f32.xlu0 %v475_v49 }
 0x4f0   :  { %484 = vrot.lane.b32.xlu1 %v2466_v27, %s2311_s19 }
 0x4f4   :  { %482 = vrot.lane.b32.xlu2 %v2462_v25, %s2311_s19 }
 0x4ff   :  { %581 = vrot.lane.b32.xlu0 %v2466_v27, %s2312_s20 }
 0x546   :  { %v656_v50 = vpop.xlane.xlu2 %655 }
 0x547   :  { %v660_v51 = vsub.f32 %v649_v26, %v656_v50 }
 0x549   :  { %v662_v52 = vmul.f32 1.442695, %v660_v51 }
 0x54a   :  { %v562_v53 = vpop.xlane.xlu1 %561 }
 0x54b   :  { %2189 = vpow2.f32 %v662_v52  ;;  %v564_v54 = vsub.f32 %v555_v31, %v562_v53 }
 0x54d   :  { %v567_v55 = vmul.f32 1.442695, %v564_v54 }
 0x54e   :  { %v659_v56 = vpop.xlane.xlu0 %658 }
 0x54f   :  { %2191 = vpow2.f32 %v567_v55  ;;  %v474_v62 = vpop.xlane.xlu2 %473  ;;  %v661_v12 = vsub.f32 %v2542_v38, %v659_v56 }
 0x550   :  { %2193 = vrcp.f32 %v474_v62 }
 0x551   :  { %v2190_v57 = vpop.eup %2189  ;;  %v664_v13 = vmul.f32 1.442695, %v661_v12 }
 0x552   :  { %v666_v58 = vsel %vm360_vm11, %v2190_v57, 0.0 }
 0x553   :  { %667 = vadd.xlane.f32.xlu1 %v666_v58 }
 0x555   :  { %v2192_v59 = vpop.eup %2191 }
 0x556   :  { %v559_v60 = vpop.xlane.xlu0 %558  ;;  %v572_v61 = vsel %vm364_vm14, %v2192_v59, 0.0  ;;  %v2194_v1 = vpop.eup %2193 }
 0x557   :  { %v563_v63 = vsub.f32 %v552_v46, %v559_v60  ;;  %573 = vadd.xlane.f32.xlu2 %v572_v61  ;;  %v483_v6 = vpop.permute.xlu2 %482  ;;  %v480_v7 = vmul.f32 %v2194_v1, %v2186_v40  ;;  %v780_v1 = vperm.slane %v2456_v10, 3 }
 0x559   :  { %v565_v0 = vmul.f32 1.442695, %v563_v63 }
 0x55b   :  { %2195 = vpow2.f32 %v565_v0 }
 0x55e   :  { %v477_v2 = vpop.xlane.xlu0 %476 }
 0x55f   :  { %2197 = vrcp.f32 %v477_v2 }
 0x560   :  { %2199 = vpow2.f32 %v664_v13 }
 0x561   :  { %v2196_v3 = vpop.eup %2195 }
 0x562   :  { %v485_v4 = vpop.permute.xlu1 %484  ;;  %v569_v5 = vsel %vm360_vm11, %v2196_v3, 0.0 }
 0x563   :  { %1930 = vmatpush.msk.msrb.mxu1 %vm395_vm1, %v485_v4  ;;  %570 = vadd.xlane.f32.xlu0 %v569_v5 }
 0x565   :  { %510 = vmatpush.msrb.mxu1 %v483_v6  ;;  %v2198_v8 = vpop.eup %2197 }
 0x566   :  { %1931 = vmatmul.msk.f32.vlgmr.msrb.gmra.mxu1 %vm360_vm11, %v480_v7  ;;  %v481_v9 = vmul.f32 %v2198_v8, %v2188_v48  ;;  %v2200_v14 = vpop.eup %2199  ;;  %v2098_v48 = vld [vmem:[%s2884_s5] sm:$0xff] }
 0x567   :  { %v669_v15 = vsel %vm364_vm14, %v2200_v14, 0.0  ;;  %771 = vmatpush.bf16.msrb.mxu2 %v2098_v48  ;;  %v830_v48 = vperm.slane %v2456_v10, 5 }
 0x56c   :  { %676 = vrot.lane.b32.xlu1 %v2462_v25, %s2313_s21 }
 0x56e   :  { %1932 = vmatmul.msk.f32.gmra.mxu1 %vm360_vm11, %v481_v9 }
 0x571   :  { %v582_v11 = vpop.permute.xlu0 %581 }
 0x572   :  { %1937 = vmatpush.msk.msra.mxu3 %vm395_vm1, %v582_v11 }
 0x577   :  { %579 = vrot.lane.b32.xlu0 %v2462_v25, %s2312_s20 }
 0x57f   :  { %678 = vrot.lane.b32.xlu0 %v2466_v27, %s2313_s21 }
 0x5a9   :  { %670 = vadd.xlane.f32.xlu0 %v669_v15 }
 0x5c6   :  { %v668_v22 = vpop.xlane.xlu1 %667 }
 0x5ca   :  { %v574_v18 = vpop.xlane.xlu2 %573 }
 0x5d6   :  { %v571_v16 = vpop.xlane.xlu0 %570 }
 0x5d7   :  { %2201 = vrcp.f32 %v571_v16 }
 0x5d8   :  { %2203 = vrcp.f32 %v574_v18 }
 0x5d9   :  { %2205 = vrcp.f32 %v668_v22  ;;  %v2100_v22 = vld [vmem:[%s2885_s6] sm:$0xff] }
 0x5dd   :  { %v2202_v21 = vpop.eup %2201 }
 0x5de   :  { %v577_v23 = vmul.f32 %v2202_v21, %v2196_v3  ;;  %v2204_v26 = vpop.eup %2203  ;;  %v677_v33 = vpop.permute.xlu1 %676 }
 0x5df   :  { %v2206_v28 = vpop.eup %2205  ;;  %v578_v30 = vmul.f32 %v2204_v26, %v2192_v59 }
 0x5e0   :  { %v674_v31 = vmul.f32 %v2206_v28, %v2190_v57 }
 0x5e3   :  { %v512_v17 = vpop.f32.mrf.mxu1 }
 0x5e9   :  { %v580_v25 = vpop.permute.xlu0 %579 }
 0x5ea   :  { %607 = vmatpush.msra.mxu3 %v580_v25 }
 0x5eb   :  { %v515_v27 = vpop.f32.mrf.mxu1  ;;  %1938 = vmatmul.msk.f32.vlgmr.msra.gmra.mxu3 %vm360_vm11, %v577_v23 }
 0x5ec   :  { %v2137_v24 = vpack.i.bf16 %v515_v27, %v512_v17  ;;  %v2101_v17 = vld [vmem:[%s2885_s6 + $0x8] sm:$0xff] }
 0x5ed   :  { %860 = vmatpush.bf16.msrb.mxu3 %v2101_v17 }
 0x5ee   :  { %2138 = vrot.lane.b32.xlu2 %v2137_v24, %s2314_s22 }
 0x5f1   :  { %v679_v29 = vpop.permute.xlu0 %678  ;;  %861 = vmatpush.bf16.msrb.mxu3 %v2100_v22 }
 0x5f2   :  { %1944 = vmatpush.msk.msra.mxu1 %vm395_vm1, %v679_v29 }
 0x5f3   :  { %1939 = vmatmul.msk.f32.gmra.mxu3 %vm360_vm11, %v578_v30 }
 0x5f4   :  { %704 = vmatpush.msra.mxu1 %v677_v33 }
 0x5f5   :  { %1945 = vmatmul.msk.f32.vlgmr.msra.gmra.mxu1 %vm360_vm11, %v674_v31 }
 0x61c   :  { %v671_v34 = vpop.xlane.xlu0 %670 }
 0x61d   :  { %2207 = vrcp.f32 %v671_v34 }
 0x623   :  { %v2208_v36 = vpop.eup %2207 }
 0x624   :  { %v675_v38 = vmul.f32 %v2208_v36, %v2200_v14 }
 0x626   :  { %1946 = vmatmul.msk.f32.gmra.mxu1 %vm360_vm11, %v675_v38 }
 0x648   :  { %v2139_v49 = vpop.permute.xlu2 %2138 }
 0x649   :  { %v2141_v51 = vunpack.i.h.bf16 %v2139_v49  ;;  %v2140_v52 = vunpack.i.l.bf16 %v2139_v49 }
 0x64b   :  { %v737_v56 = vsel %vm328_vm13, %v2535_v20, %v2141_v51  ;;  %v736_v57 = vsel %vm328_vm13, %v2533_v19, %v2140_v52 }
 0x66e   :  { %v609_v39 = vpop.f32.mrf.mxu3 }
 0x672   :  { %v706_v43 = vpop.f32.mrf.mxu1 }
 0x676   :  { %v612_v40 = vpop.f32.mrf.mxu3 }
 0x677   :  { %v2142_v42 = vpack.i.bf16 %v612_v40, %v609_v39 }
 0x679   :  { %2143 = vrot.lane.b32.xlu1 %v2142_v42, %s2315_s23 }
 0x6a3   :  { %v709_v45 = vpop.f32.mrf.mxu1 }
 0x6a4   :  { %v2147_v46 = vpack.i.bf16 %v709_v45, %v706_v43  ;;  %v827_v43 = vperm.slane %v2456_v10, 4 }
 0x6a6   :  { %2148 = vrot.lane.b32.xlu2 %v2147_v46, %s2316_s24 }
 0x6eb   :  { %v2144_v50 = vpop.permute.xlu1 %2143 }
 0x6ec   :  { %v2146_v53 = vunpack.i.h.bf16 %v2144_v50  ;;  %v2145_v54 = vunpack.i.l.bf16 %v2144_v50 }
 0x6ee   :  { %v739_v60 = vsel %vm738_vm15, %v736_v57, %v2145_v54  ;;  %v740_v61 = vsel %vm738_vm15, %v737_v56, %v2146_v53 }
 0x700   :  { %v2149_v55 = vpop.permute.xlu2 %2148 }
 0x701   :  { %v2151_v58 = vunpack.i.h.bf16 %v2149_v55  ;;  %v2150_v59 = vunpack.i.l.bf16 %v2149_v55  ;;  %v838_v55 = vperm.slane %v2456_v10, 6 }
 0x703   :  { %v742_v62 = vsel %vm741_vm2, %v739_v60, %v2150_v59  ;;  %v743_v63 = vsel %vm741_vm2, %v740_v61, %v2151_v58 }
 0x704   :  { %v744_v0 = vpack.c.bf16 %v743_v63, %v742_v62 }
 0x706   :  { %1955 = vmatmul.msk.bf16.vlgmr.msrb.gmra.mxu2 %vm228_vm4, %v744_v0 }
 0x789   :  { %v773_v2 = vpop.f32.mrf.mxu2 }
 0x78a   :  { %v778_v20 = vadd.f32 %v773_v2, %v2431_v35  ;;  %v2105_v2 = vld [vmem:[%s2886_s7 + $0x18] sm:$0xff] }
 0x78b   :  { %966 = vmatpush.bf16.msra.mxu0 %v2105_v2 }
 0x78c   :  { %v2596_v3 = vadd.f32 %v780_v1, %v778_v20 }
 0x78e   :  { %v783_v19 = vsel %vm228_vm4, %v2596_v3, 0.0 }
 0x78f   :  { %784 = vadd.xlane.f32.xlu0 %v783_v19 }
 0x791   :  { %v775_v4 = vpop.f32.mrf.mxu2 }
 0x792   :  { %v779_v5 = vadd.f32 %v775_v4, %v2427_v32 }
 0x794   :  { %v2601_v6 = vadd.f32 %v780_v1, %v779_v5  ;;  %v2104_v5 = vld [vmem:[%s2886_s7 + $0x10] sm:$0xff] }
 0x795   :  { %967 = vmatpush.bf16.msra.mxu0 %v2104_v5 }
 0x796   :  { %v786_v7 = vsel %vm232_vm5, %v2601_v6, 0.0 }
 0x797   :  { %787 = vadd.xlane.f32.xlu1 %v786_v7 }
 0x802   :  { %v785_v8 = vpop.xlane.xlu0 %784 }
 0x803   :  { %v789_v9 = vmul.f32 %v785_v8, %v2437_v44 }
 0x805   :  { %v791_v35 = vsub.f32 %v2596_v3, %v789_v9  ;;  %v2103_v9 = vld [vmem:[%s2886_s7 + $0x8] sm:$0xff] }
 0x806   :  { %968 = vmatpush.bf16.msra.mxu0 %v2103_v9 }
 0x807   :  { %v793_v11 = vmul.f32 %v791_v35, %v791_v35 }
 0x809   :  { %v795_v12 = vsel %vm228_vm4, %v793_v11, 0.0 }
 0x80a   :  { %796 = vadd.xlane.f32.xlu2 %v795_v12  ;;  %v788_v13 = vpop.xlane.xlu1 %787 }
 0x80b   :  { %v790_v14 = vmul.f32 %v788_v13, %v2437_v44 }
 0x80d   :  { %v792_v32 = vsub.f32 %v2601_v6, %v790_v14  ;;  %v2102_v14 = vld [vmem:[%s2886_s7] sm:$0xff] }
 0x80e   :  { %969 = vmatpush.bf16.msra.mxu0 %v2102_v14 }
 0x80f   :  { %v794_v15 = vmul.f32 %v792_v32, %v792_v32 }
 0x811   :  { %v798_v16 = vsel %vm232_vm5, %v794_v15, 0.0 }
 0x812   :  { %799 = vadd.xlane.f32.xlu0 %v798_v16 }
 0x87d   :  { %v797_v18 = vpop.xlane.xlu2 %796 }
 0x87e   :  { %v801_v21 = vmul.f32 %v797_v18, %v2437_v44 }
 0x880   :  { %v803_v23 = vadd.f32 1e-05, %v801_v21 }
 0x882   :  { %2209 = vrsqrt.f32 %v803_v23  ;;  %vm811_vm6 = vweird.f32 %v803_v23 }
 0x885   :  { %v800_v25 = vpop.xlane.xlu0 %799 }
 0x886   :  { %v802_v27 = vmul.f32 %v800_v25, %v2437_v44 }
 0x888   :  { %v2210_v24 = vpop.eup %2209  ;;  %v804_v26 = vadd.f32 1e-05, %v802_v27 }
 0x889   :  { %v806_v28 = vmul.f32 %v2210_v24, %v803_v23  ;;  %vm812_vm3 = vweird.f32 %v2210_v24 }
 0x88a   :  { %2211 = vrsqrt.f32 %v804_v26  ;;  %vm813_vm7 = vmor %vm811_vm6, %vm812_vm3  ;;  %vm821_vm9 = vweird.f32 %v804_v26 }
 0x88b   :  { %v807_v29 = vmul.f32 %v2210_v24, %v806_v28 }
 0x88d   :  { %v808_v30 = vmul.f32 0.5, %v807_v29 }
 0x88f   :  { %v809_v31 = vsub.f32 1.5, %v808_v30 }
 0x890   :  { %v2212_v33 = vpop.eup %2211 }
 0x891   :  { %v810_v34 = vmul.f32 %v2210_v24, %v809_v31  ;;  %v816_v36 = vmul.f32 %v2212_v33, %v804_v26  ;;  %vm822_vm8 = vweird.f32 %v2212_v33 }
 0x892   :  { %vm823_vm10 = vmor %vm821_vm9, %vm822_vm8 }
 0x893   :  { %v817_v38 = vmul.f32 %v2212_v33, %v816_v36  ;;  %v814_v39 = vsel %vm813_vm7, %v2210_v24, %v810_v34 }
 0x894   :  { %v825_v45 = vmul.f32 %v814_v39, %v791_v35 }
 0x895   :  { %v818_v40 = vmul.f32 0.5, %v817_v38 }
 0x896   :  { %v828_v49 = vmul.f32 %v827_v43, %v825_v45 }
 0x897   :  { %v819_v42 = vsub.f32 1.5, %v818_v40 }
 0x898   :  { %v831_v52 = vadd.f32 %v830_v48, %v828_v49 }
 0x899   :  { %v820_v46 = vmul.f32 %v2212_v33, %v819_v42 }
 0x89b   :  { %v824_v47 = vsel %vm823_vm10, %v2212_v33, %v820_v46 }
 0x89c   :  { %v826_v50 = vmul.f32 %v824_v47, %v792_v32 }
 0x89e   :  { %v829_v51 = vmul.f32 %v827_v43, %v826_v50  ;;  %v2317_v50 = vmov 1.0  }
 0x8a0   :  { %v832_v53 = vadd.f32 %v830_v48, %v829_v51 }
 0x8a2   :  { %v833_v54 = vpack.c.bf16 %v832_v53, %v831_v52 }
 0x8a4   :  { %1964 = vmatmul.msk.bf16.vlgmr.msrb.gmra.mxu3 %vm228_vm4, %v833_v54 }
 0x927   :  { %v863_v56 = vpop.f32.mrf.mxu3 }
 0x928   :  { %v2623_v57 = vadd.f32 %v863_v56, %v838_v55 }
 0x92a   :  { %v870_v58 = vmul.f32 0.70710677, %v2623_v57 }
 0x92c   :  { %v876_v59 = vand.u32 2147483647, %v870_v58  ;;  %vm872_vm12 = vcmp.lt.f32.partialorder %v870_v58, 0.0 }
 0x92d   :  { %v874_v51 = vsel %vm872_vm12, -1.0, %v2317_v50 }
 0x92e   :  { %v878_v60 = vmul.f32 0.3275911, %v876_v59  ;;  %v908_v11 = vsub.f32 0.0, %v876_v59 }
 0x92f   :  { %v865_v61 = vpop.f32.mrf.mxu3 }
 0x930   :  { %v880_v62 = vadd.f32 1.0, %v878_v60  ;;  %v2626_v63 = vadd.f32 %v865_v61, %v838_v55  ;;  %v910_v16 = vmul.f32 %v908_v11, %v876_v59  ;;  %v868_v60 = vmul.f32 0.5, %v2623_v57 }
 0x932   :  { %2213 = vrcp.f32 %v880_v62  ;;  %v871_v0 = vmul.f32 0.70710677, %v2626_v63  ;;  %v912_v23 = vmul.f32 1.442695, %v910_v16  ;;  %v869_v61 = vmul.f32 0.5, %v2626_v63 }
 0x934   :  { %v877_v1 = vand.u32 2147483647, %v871_v0  ;;  %vm873_vm3 = vcmp.lt.f32.partialorder %v871_v0, 0.0 }
 0x935   :  { %v875_v55 = vsel %vm873_vm3, -1.0, %v2317_v50 }
 0x936   :  { %v879_v20 = vmul.f32 0.3275911, %v877_v1  ;;  %v909_v25 = vsub.f32 0.0, %v877_v1 }
 0x938   :  { %v2214_v19 = vpop.eup %2213  ;;  %v881_v4 = vadd.f32 1.0, %v879_v20  ;;  %v911_v29 = vmul.f32 %v909_v25, %v877_v1  ;;  %v978_v20 = vperm.slane %v2456_v10, 7 }
 0x939   :  { %v884_v7 = vmul.f32 %v2214_v19, %v880_v62 }
 0x93a   :  { %2215 = vrcp.f32 %v881_v4  ;;  %v914_v36 = vmul.f32 1.442695, %v911_v29 }
 0x93b   :  { %v886_v8 = vsub.f32 2.0, %v884_v7  ;;  %2217 = vpow2.f32 %v912_v23 }
 0x93c   :  { %2219 = vpow2.f32 %v914_v36  ;;  %v2674_v36 = vld [vmem:[%s2882_s3 + $0x8] sm:$0xff] }
 0x93d   :  { %v888_v35 = vmul.f32 %v2214_v19, %v886_v8 }
 0x93f   :  { %v890_v12 = vmul.f32 1.0614054, %v888_v35 }
 0x940   :  { %v2216_v13 = vpop.eup %2215 }
 0x941   :  { %v892_v32 = vadd.f32 -1.4531521, %v890_v12  ;;  %v885_v15 = vmul.f32 %v2216_v13, %v881_v4  ;;  %v2218_v40 = vpop.eup %2217 }
 0x942   :  { %v2220_v49 = vpop.eup %2219 }
 0x943   :  { %v894_v17 = vmul.f32 %v892_v32, %v888_v35  ;;  %v887_v18 = vsub.f32 2.0, %v885_v15  ;;  %v2107_v15 = vld [vmem:[%s2883_s4 + $0x18] sm:$0xff] }
 0x944   :  { %1061 = vmatpush.bf16.msrb.mxu1 %v2107_v15 }
 0x945   :  { %v896_v21 = vadd.f32 1.4214138, %v894_v17  ;;  %v889_v22 = vmul.f32 %v2216_v13, %v887_v18  ;;  %v2106_v18 = vld [vmem:[%s2883_s4 + $0x10] sm:$0xff]  ;;  %s1850_s4 = sshll.u32 %s2319_s1, 4  ;;  %s1851_s4 = int_to_ptr.vmem [resolvable:$true] %s1850_s4 }
 0x947   :  { %v898_v27 = vmul.f32 %v896_v21, %v888_v35  ;;  %v891_v24 = vmul.f32 1.0614054, %v889_v22 }
 0x948   :  { %1062 = vmatpush.bf16.msrb.mxu1 %v2106_v18 }
 0x949   :  { %v900_v26 = vadd.f32 -0.28449672, %v898_v27  ;;  %v893_v28 = vadd.f32 -1.4531521, %v891_v24 }
 0x94b   :  { %v902_v30 = vmul.f32 %v900_v26, %v888_v35  ;;  %v895_v31 = vmul.f32 %v893_v28, %v889_v22 }
 0x94d   :  { %v904_v33 = vadd.f32 0.2548296, %v902_v30  ;;  %v897_v34 = vadd.f32 1.4214138, %v895_v31 }
 0x94f   :  { %v906_v38 = vmul.f32 %v904_v33, %v888_v35  ;;  %v899_v39 = vmul.f32 %v897_v34, %v889_v22 }
 0x951   :  { %v916_v42 = vmul.f32 %v2218_v40, %v906_v38  ;;  %v901_v43 = vadd.f32 -0.28449672, %v899_v39 }
 0x953   :  { %v903_v45 = vmul.f32 %v901_v43, %v889_v22  ;;  %v918_v46 = vsub.f32 1.0, %v916_v42  ;;  %v1027_v42 = vperm.slane %v2674_v36, 0 }
 0x955   :  { %v905_v47 = vadd.f32 0.2548296, %v903_v45  ;;  %v920_v52 = vmul.f32 %v918_v46, %v874_v51 }
 0x957   :  { %v907_v48 = vmul.f32 %v905_v47, %v889_v22  ;;  %v922_v56 = vadd.f32 1.0, %v920_v52  ;;  %v1030_v47 = vperm.slane %v2674_v36, 1 }
 0x959   :  { %v917_v53 = vmul.f32 %v2220_v49, %v907_v48  ;;  %v924_v62 = vmul.f32 %v922_v56, %v868_v60 }
 0x95b   :  { %v919_v54 = vsub.f32 1.0, %v917_v53 }
 0x95d   :  { %v921_v59 = vmul.f32 %v919_v54, %v875_v55  ;;  %v1039_v55 = vperm.slane %v2674_v36, 2 }
 0x95f   :  { %v923_v58 = vadd.f32 1.0, %v921_v59 }
 0x961   :  { %v925_v1 = vmul.f32 %v923_v58, %v869_v61 }
 0x963   :  { %v926_v2 = vpack.c.bf16 %v925_v1, %v924_v62 }
 0x965   :  { %1981 = vmatmul.msk.bf16.vlgmr.msra.gmra.mxu0 %vm143_vm0, %v926_v2 }
 0x9e2   :  { %v971_v19 = vpop.f32.mrf.mxu0 }
 0x9e3   :  { %v976_v0 = vadd.f32 %v971_v19, %v2596_v3 }
 0x9e5   :  { %v2648_v4 = vadd.f32 %v978_v20, %v976_v0 }
 0x9e7   :  { %v983_v5 = vsel %vm228_vm4, %v2648_v4, 0.0 }
 0x9e8   :  { %984 = vadd.xlane.f32.xlu0 %v983_v5 }
 0x9ea   :  { %v973_v57 = vpop.f32.mrf.mxu0 }
 0x9eb   :  { %v977_v63 = vadd.f32 %v973_v57, %v2601_v6 }
 0x9ed   :  { %v2653_v7 = vadd.f32 %v978_v20, %v977_v63 }
 0x9ef   :  { %v986_v8 = vsel %vm232_vm5, %v2653_v7, 0.0 }
 0x9f0   :  { %987 = vadd.xlane.f32.xlu0 %v986_v8 }
 0xa5b   :  { %v985_v9 = vpop.xlane.xlu0 %984 }
 0xa5c   :  { %v989_v10 = vmul.f32 %v985_v9, %v2437_v44 }
 0xa5e   :  { %v991_v3 = vsub.f32 %v2648_v4, %v989_v10 }
 0xa60   :  { %v993_v35 = vmul.f32 %v991_v3, %v991_v3 }
 0xa62   :  { %v995_v11 = vsel %vm228_vm4, %v993_v35, 0.0 }
 0xa63   :  { %996 = vadd.xlane.f32.xlu0 %v995_v11  ;;  %v988_v12 = vpop.xlane.xlu0 %987 }
 0xa64   :  { %v990_v13 = vmul.f32 %v988_v12, %v2437_v44 }
 0xa66   :  { %v992_v6 = vsub.f32 %v2653_v7, %v990_v13 }
 0xa68   :  { %v994_v14 = vmul.f32 %v992_v6, %v992_v6 }
 0xa6a   :  { %v998_v32 = vsel %vm232_vm5, %v994_v14, 0.0 }
 0xa6b   :  { %999 = vadd.xlane.f32.xlu0 %v998_v32 }
 0xad6   :  { %v997_v16 = vpop.xlane.xlu0 %996 }
 0xad7   :  { %v1001_v17 = vmul.f32 %v997_v16, %v2437_v44 }
 0xad9   :  { %v1003_v21 = vadd.f32 1e-05, %v1001_v17 }
 0xadb   :  { %2221 = vrsqrt.f32 %v1003_v21  ;;  %vm1011_vm7 = vweird.f32 %v1003_v21 }
 0xade   :  { %v1000_v22 = vpop.xlane.xlu0 %999 }
 0xadf   :  { %v1002_v23 = vmul.f32 %v1000_v22, %v2437_v44 }
 0xae1   :  { %v2222_v25 = vpop.eup %2221  ;;  %v1004_v27 = vadd.f32 1e-05, %v1002_v23 }
 0xae2   :  { %v1006_v24 = vmul.f32 %v2222_v25, %v1003_v21  ;;  %vm1012_vm6 = vweird.f32 %v2222_v25 }
 0xae3   :  { %2223 = vrsqrt.f32 %v1004_v27  ;;  %vm1013_vm8 = vmor %vm1011_vm7, %vm1012_vm6  ;;  %vm1021_vm10 = vweird.f32 %v1004_v27 }
 0xae4   :  { %v1007_v26 = vmul.f32 %v2222_v25, %v1006_v24 }
 0xae6   :  { %v1008_v28 = vmul.f32 0.5, %v1007_v26 }
 0xae8   :  { %v1009_v29 = vsub.f32 1.5, %v1008_v28 }
 0xae9   :  { %v2224_v30 = vpop.eup %2223 }
 0xaea   :  { %v1010_v31 = vmul.f32 %v2222_v25, %v1009_v29  ;;  %v1016_v33 = vmul.f32 %v2224_v30, %v1004_v27  ;;  %vm1022_vm9 = vweird.f32 %v2224_v30 }
 0xaeb   :  { %vm1023_vm12 = vmor %vm1021_vm10, %vm1022_vm9 }
 0xaec   :  { %v1017_v34 = vmul.f32 %v2224_v30, %v1016_v33  ;;  %v1014_v38 = vsel %vm1013_vm8, %v2222_v25, %v1010_v31  ;;  %vm1775_vm8 = vcmask 258048  }
 0xaed   :  { %v1025_v43 = vmul.f32 %v1014_v38, %v991_v3 }
 0xaee   :  { %v1018_v39 = vmul.f32 0.5, %v1017_v34 }
 0xaef   :  { %v1028_v48 = vmul.f32 %v1027_v42, %v1025_v43 }
 0xaf0   :  { %v1019_v40 = vsub.f32 1.5, %v1018_v39 }
 0xaf1   :  { %v1031_v52 = vadd.f32 %v1030_v47, %v1028_v48 }
 0xaf2   :  { %v1020_v45 = vmul.f32 %v2224_v30, %v1019_v40 }
 0xaf4   :  { %v1024_v46 = vsel %vm1023_vm12, %v2224_v30, %v1020_v45 }
 0xaf5   :  { %v1026_v49 = vmul.f32 %v1024_v46, %v992_v6 }
 0xaf7   :  { %v1029_v51 = vmul.f32 %v1027_v42, %v1026_v49 }
 0xaf9   :  { %v1032_v53 = vadd.f32 %v1030_v47, %v1029_v51 }
 0xafb   :  { %v1033_v54 = vpack.c.bf16 %v1032_v53, %v1031_v52 }
 0xafd   :  { %1995 = vmatmul.msk.bf16.vlgmr.msrb.gmra.mxu1 %vm228_vm4, %v1033_v54 }
 0xb7a   :  { %v1064_v56 = vpop.f32.mrf.mxu1 }
 0xb7b   :  { %v2680_v59 = vadd.f32 %v1064_v56, %v1039_v55 }
 0xb7d   :  { %1071 = vrot.lane.b32.xlu0 %v2680_v59, %s2303_s12 }
 0xb82   :  { %v1066_v60 = vpop.f32.mrf.mxu1 }
 0xb83   :  { %v2684_v61 = vadd.f32 %v1066_v60, %v1039_v55 }
 0xb85   :  { %1170 = vrot.lane.b32.xlu2 %v2684_v61, %s2307_s15  ;;  %1073 = vrot.lane.b32.xlu1 %v2684_v61, %s2303_s12 }
 0xb86   :  { %1267 = vrot.lane.b32.xlu0 %v2684_v61, %s2305_s14 }
 0xb8d   :  { %1164 = vrot.lane.b32.xlu2 %v2680_v59, %s2304_s13  ;;  %1168 = vrot.lane.b32.xlu1 %v2680_v59, %s2307_s15 }
 0xb8e   :  { %1265 = vrot.lane.b32.xlu0 %v2680_v59, %s2305_s14 }
 0xb95   :  { %1166 = vrot.lane.b32.xlu2 %v2684_v61, %s2304_s13  ;;  %1261 = vrot.lane.b32.xlu1 %v2680_v59, %s2309_s17 }
 0xb96   :  { %1364 = vrot.lane.b32.xlu0 %v2684_v61, %s2308_s16 }
 0xb9d   :  { %1362 = vrot.lane.b32.xlu2 %v2680_v59, %s2308_s16  ;;  %1263 = vrot.lane.b32.xlu1 %v2684_v61, %s2309_s17 }
 0xb9e   :  { %1358 = vrot.lane.b32.xlu0 %v2680_v59, %s2310_s18 }
 0xba5   :  { %1130 = vrot.lane.b32.xlu2 %v2684_v61, %s2302_s11  ;;  %1360 = vrot.lane.b32.xlu1 %v2684_v61, %s2310_s18 }
 0xba6   :  { %1128 = vrot.lane.b32.xlu0 %v2680_v59, %s2302_s11  ;;  %s1852_s11 = sshll.u32 %s2889_s10, 4  ;;  %s1853_s11 = int_to_ptr.hbm [resolvable:$true] %s1852_s11 }
 0xbad   :  { %1227 = vrot.lane.b32.xlu1 %v2684_v61, %s2311_s19 }
 0xbae   :  { %1225 = vrot.lane.b32.xlu0 %v2680_v59, %s2311_s19 }
 0xbdf   :  { %v1171_v58 = vpop.permute.xlu2 %1170 }
 0xbe0   :  { %2003 = vmatpush.xpose.msk.msrb.mxu0 %vm328_vm13, %v1171_v58 }
 0xbe7   :  { %v1165_v62 = vpop.permute.xlu2 %1164 }
 0xbef   :  { %v1167_v1 = vpop.permute.xlu2 %1166  ;;  %v1072_v2 = vpop.permute.xlu0 %1071 }
 0xbf7   :  { %v1074_v20 = vpop.permute.xlu1 %1073  ;;  %v1363_v19 = vpop.permute.xlu2 %1362 }
 0xbf8   :  { %v1268_v0 = vpop.permute.xlu0 %1267  ;;  %1996 = vmatpush.xpose.msk.msra.mxu2 %vm328_vm13, %v1074_v20 }
 0xbfc   :  { %1997 = vmatpush.xpose.msk.msra.mxu2 %vm328_vm13, %v1072_v2 }
 0xbff   :  { %v1131_v5 = vpop.permute.xlu2 %1130  ;;  %v1169_v57 = vpop.permute.xlu1 %1168  ;;  %1998 = vmatmul.msk.f32.vlgmr.msra.gmra.mxu2 %vm328_vm13, %v2680_v59 }
 0xc00   :  { %2010 = vmatpush.xpose.msk.msrb.mxu2 %vm328_vm13, %v1268_v0  ;;  %v1266_v63 = vpop.permute.xlu0 %1265  ;;  %2000 = vmatpush.msk.msra.mxu3 %vm395_vm1, %v1131_v5 }
 0xc01   :  { %2004 = vmatpush.xpose.msk.msrb.mxu0 %vm328_vm13, %v1169_v57 }
 0xc04   :  { %2011 = vmatpush.xpose.msk.msrb.mxu2 %vm328_vm13, %v1266_v63  ;;  %2005 = vmatmul.msk.f32.vlgmr.msrb.gmra.mxu0 %vm328_vm13, %v1165_v62 }
 0xc07   :  { %v1262_v8 = vpop.permute.xlu1 %1261  ;;  %1999 = vmatmul.msk.f32.gmra.mxu2 %vm328_vm13, %v2684_v61 }
 0xc08   :  { %v1365_v9 = vpop.permute.xlu0 %1364 }
 0xc09   :  { %2017 = vmatpush.xpose.msk.msra.mxu0 %vm328_vm13, %v1365_v9 }
 0xc0c   :  { %2006 = vmatmul.msk.f32.gmra.mxu0 %vm328_vm13, %v1167_v1 }
 0xc0d   :  { %2018 = vmatpush.xpose.msk.msra.mxu0 %vm328_vm13, %v1363_v19 }
 0xc0f   :  { %v1264_v10 = vpop.permute.xlu1 %1263  ;;  %2012 = vmatmul.msk.f32.vlgmr.msrb.gmra.mxu2 %vm328_vm13, %v1262_v8 }
 0xc10   :  { %v1359_v3 = vpop.permute.xlu0 %1358 }
 0xc14   :  { %2019 = vmatmul.msk.f32.vlgmr.msra.gmra.mxu0 %vm328_vm13, %v1359_v3 }
 0xc17   :  { %v1361_v35 = vpop.permute.xlu1 %1360  ;;  %2013 = vmatmul.msk.f32.gmra.mxu2 %vm328_vm13, %v1264_v10 }
 0xc18   :  { %v1129_v11 = vpop.permute.xlu0 %1128 }
 0xc19   :  { %1156 = vmatpush.msra.mxu3 %v1129_v11 }
 0xc1c   :  { %2020 = vmatmul.msk.f32.gmra.mxu0 %vm328_vm13, %v1361_v35 }
 0xc1f   :  { %v1228_v12 = vpop.permute.xlu1 %1227 }
 0xc20   :  { %2007 = vmatpush.msk.msra.mxu1 %vm395_vm1, %v1228_v12  ;;  %v1226_v13 = vpop.permute.xlu0 %1225 }
 0xc22   :  { %1253 = vmatpush.msra.mxu1 %v1226_v13 }
 0xc81   :  { %v1197_v6 = vpop.f32.mrf.mxu0 }
 0xc82   :  { %v1198_v14 = vadd.f32 %v1197_v6, %v2484_v37  ;;  %v1100_v32 = vpop.f32.mrf.mxu2 }
 0xc83   :  { %v1101_v15 = vadd.f32 %v1100_v32, %v2484_v37 }
 0xc84   :  { %v1203_v16 = vsel %vm360_vm11, %v1198_v14, -inf }
 0xc85   :  { %1204 = vmax.xlane.f32.xlu0 %v1203_v16  ;;  %v1106_v17 = vsel %vm360_vm11, %v1101_v15, -inf }
 0xc86   :  { %1107 = vmax.xlane.f32.xlu2 %v1106_v17 }
 0xc89   :  { %v1200_v18 = vpop.f32.mrf.mxu0 }
 0xc8a   :  { %v1201_v21 = vadd.f32 %v1200_v18, %v2488_v41  ;;  %v1103_v22 = vpop.f32.mrf.mxu2 }
 0xc8b   :  { %v1104_v23 = vadd.f32 %v1103_v22, %v2488_v41 }
 0xc8c   :  { %v1206_v27 = vsel %vm364_vm14, %v1201_v21, -inf }
 0xc8d   :  { %v1109_v25 = vsel %vm364_vm14, %v1104_v23, -inf }
 0xc8e   :  { %1110 = vmax.xlane.f32.xlu1 %v1109_v25  ;;  %1207 = vmax.xlane.f32.xlu2 %v1206_v27 }
 0xc91   :  { %v1391_v24 = vpop.f32.mrf.mxu0 }
 0xc92   :  { %v1392_v26 = vadd.f32 %v1391_v24, %v2484_v37  ;;  %v1294_v28 = vpop.f32.mrf.mxu2 }
 0xc93   :  { %v1295_v29 = vadd.f32 %v1294_v28, %v2484_v37 }
 0xc94   :  { %v1397_v31 = vsel %vm360_vm11, %v1392_v26, -inf }
 0xc95   :  { %v1300_v30 = vsel %vm360_vm11, %v1295_v29, -inf }
 0xc96   :  { %1301 = vmax.xlane.f32.xlu0 %v1300_v30  ;;  %1398 = vmax.xlane.f32.xlu1 %v1397_v31 }
 0xc99   :  { %v1394_v33 = vpop.f32.mrf.mxu0 }
 0xc9a   :  { %v1395_v34 = vadd.f32 %v1394_v33, %v2488_v41  ;;  %v1297_v38 = vpop.f32.mrf.mxu2 }
 0xc9b   :  { %v1298_v39 = vadd.f32 %v1297_v38, %v2488_v41 }
 0xc9c   :  { %v1400_v42 = vsel %vm364_vm14, %v1395_v34, -inf }
 0xc9d   :  { %v1303_v40 = vsel %vm364_vm14, %v1298_v39, -inf }
 0xc9e   :  { %1304 = vmax.xlane.f32.xlu2 %v1303_v40  ;;  %1401 = vmax.xlane.f32.xlu0 %v1400_v42 }
 0xcb6   :  { %1322 = vrot.lane.b32.xlu2 %v2680_v59, %s2312_s20 }
 0xcf8   :  { %v1205_v37 = vpop.xlane.xlu0 %1204 }
 0xcf9   :  { %v1209_v43 = vsub.f32 %v1198_v14, %v1205_v37  ;;  %v1108_v45 = vpop.xlane.xlu2 %1107 }
 0xcfa   :  { %v1112_v47 = vsub.f32 %v1101_v15, %v1108_v45 }
 0xcfb   :  { %v1211_v46 = vmul.f32 1.442695, %v1209_v43 }
 0xcfc   :  { %v1114_v48 = vmul.f32 1.442695, %v1112_v47 }
 0xcfd   :  { %2225 = vpow2.f32 %v1211_v46 }
 0xcfe   :  { %2227 = vpow2.f32 %v1114_v48 }
 0xd01   :  { %v1111_v49 = vpop.xlane.xlu1 %1110  ;;  %v1208_v51 = vpop.xlane.xlu2 %1207 }
 0xd02   :  { %v1113_v52 = vsub.f32 %v1104_v23, %v1111_v49  ;;  %v1210_v53 = vsub.f32 %v1201_v21, %v1208_v51 }
 0xd03   :  { %v2226_v41 = vpop.eup %2225 }
 0xd04   :  { %v1215_v54 = vsel %vm360_vm11, %v2226_v41, 0.0  ;;  %v2228_v55 = vpop.eup %2227  ;;  %v1116_v56 = vmul.f32 1.442695, %v1113_v52  ;;  %v1213_v60 = vmul.f32 1.442695, %v1210_v53 }
 0xd05   :  { %1216 = vadd.xlane.f32.xlu0 %v1215_v54  ;;  %v1118_v58 = vsel %vm360_vm11, %v2228_v55, 0.0 }
 0xd06   :  { %2229 = vpow2.f32 %v1116_v56  ;;  %1119 = vadd.xlane.f32.xlu1 %v1118_v58 }
 0xd07   :  { %2231 = vpow2.f32 %v1213_v60 }
 0xd09   :  { %v1302_v62 = vpop.xlane.xlu0 %1301  ;;  %v1399_v11 = vpop.xlane.xlu1 %1398 }
 0xd0a   :  { %v1306_v1 = vsub.f32 %v1295_v29, %v1302_v62  ;;  %v1403_v12 = vsub.f32 %v1392_v26, %v1399_v11 }
 0xd0c   :  { %v2230_v2 = vpop.eup %2229  ;;  %v1308_v20 = vmul.f32 1.442695, %v1306_v1  ;;  %v1405_v13 = vmul.f32 1.442695, %v1403_v12 }
 0xd0d   :  { %v2232_v19 = vpop.eup %2231  ;;  %v1121_v0 = vsel %vm364_vm14, %v2230_v2, 0.0 }
 0xd0e   :  { %v1218_v5 = vsel %vm364_vm14, %v2232_v19, 0.0  ;;  %1122 = vadd.xlane.f32.xlu1 %v1121_v0  ;;  %2233 = vpow2.f32 %v1308_v20  ;;  %v2108_v0 = vld [vmem:[%s2884_s5 + $0x10] sm:$0xff] }
 0xd0f   :  { %1219 = vadd.xlane.f32.xlu2 %v1218_v5 }
 0xd11   :  { %v1305_v57 = vpop.xlane.xlu2 %1304  ;;  %v1402_v6 = vpop.xlane.xlu0 %1401 }
 0xd12   :  { %v1307_v63 = vsub.f32 %v1298_v39, %v1305_v57  ;;  %v1404_v14 = vsub.f32 %v1395_v34, %v1402_v6 }
 0xd14   :  { %v1310_v8 = vmul.f32 1.442695, %v1307_v63  ;;  %v2234_v9 = vpop.eup %2233  ;;  %v1407_v32 = vmul.f32 1.442695, %v1404_v14 }
 0xd15   :  { %v1312_v10 = vsel %vm360_vm11, %v2234_v9, 0.0 }
 0xd16   :  { %2235 = vpow2.f32 %v1310_v8  ;;  %1313 = vadd.xlane.f32.xlu1 %v1312_v10 }
 0xd17   :  { %2237 = vpow2.f32 %v1405_v13 }
 0xd18   :  { %2239 = vpow2.f32 %v1407_v32 }
 0xd19   :  { %1324 = vrot.lane.b32.xlu0 %v2684_v61, %s2312_s20  ;;  %v1323_v22 = vpop.permute.xlu2 %1322 }
 0xd1c   :  { %v2236_v3 = vpop.eup %2235 }
 0xd1d   :  { %v1315_v35 = vsel %vm364_vm14, %v2236_v3, 0.0  ;;  %v2238_v15 = vpop.eup %2237 }
 0xd1e   :  { %1316 = vadd.xlane.f32.xlu2 %v1315_v35  ;;  %v1409_v16 = vsel %vm360_vm11, %v2238_v15, 0.0  ;;  %v2240_v17 = vpop.eup %2239 }
 0xd1f   :  { %v1412_v18 = vsel %vm364_vm14, %v2240_v17, 0.0 }
 0xd2f   :  { %1421 = vrot.lane.b32.xlu1 %v2684_v61, %s2313_s21 }
 0xd36   :  { %1419 = vrot.lane.b32.xlu2 %v2680_v59, %s2313_s21 }
 0xd43   :  { %1410 = vadd.xlane.f32.xlu0 %v1409_v16 }
 0xd4b   :  { %1413 = vadd.xlane.f32.xlu0 %v1412_v18 }
 0xd78   :  { %v1217_v21 = vpop.xlane.xlu0 %1216 }
 0xd79   :  { %2241 = vrcp.f32 %v1217_v21  ;;  %v1120_v61 = vpop.xlane.xlu1 %1119 }
 0xd7a   :  { %2243 = vrcp.f32 %v1120_v61 }
 0xd7f   :  { %v2242_v23 = vpop.eup %2241 }
 0xd80   :  { %v1223_v25 = vmul.f32 %v2242_v23, %v2226_v41  ;;  %v2244_v59 = vpop.eup %2243 }
 0xd81   :  { %v1126_v27 = vmul.f32 %v2244_v59, %v2228_v55  ;;  %v1123_v24 = vpop.xlane.xlu1 %1122 }
 0xd82   :  { %2008 = vmatmul.msk.f32.vlgmr.msra.gmra.mxu1 %vm360_vm11, %v1223_v25  ;;  %v1220_v26 = vpop.xlane.xlu2 %1219  ;;  %2245 = vrcp.f32 %v1123_v24 }
 0xd83   :  { %2247 = vrcp.f32 %v1220_v26  ;;  %2001 = vmatmul.msk.f32.vlgmr.msra.gmra.mxu3 %vm360_vm11, %v1126_v27 }
 0xd88   :  { %v2246_v28 = vpop.eup %2245 }
 0xd89   :  { %v2248_v29 = vpop.eup %2247  ;;  %v1127_v30 = vmul.f32 %v2246_v28, %v2230_v2  ;;  %v1314_v31 = vpop.xlane.xlu1 %1313 }
 0xd8a   :  { %v1224_v34 = vmul.f32 %v2248_v29, %v2232_v19  ;;  %2249 = vrcp.f32 %v1314_v31  ;;  %v2109_v19 = vld [vmem:[%s2884_s5 + $0x18] sm:$0xff] }
 0xd8b   :  { %v1325_v33 = vpop.permute.xlu0 %1324  ;;  %2002 = vmatmul.msk.f32.gmra.mxu3 %vm360_vm11, %v1127_v30  ;;  %1512 = vmatpush.bf16.msra.mxu2 %v2109_v19  ;;  %v1572_v19 = vperm.slane %v2674_v36, 5 }
 0xd8c   :  { %2009 = vmatmul.msk.f32.gmra.mxu1 %vm360_vm11, %v1224_v34  ;;  %2014 = vmatpush.msk.msrb.mxu3 %vm395_vm1, %v1325_v33 }
 0xd8e   :  { %1350 = vmatpush.msrb.mxu3 %v1323_v22 }
 0xd8f   :  { %1513 = vmatpush.bf16.msra.mxu2 %v2108_v0 }
 0xd90   :  { %v2250_v38 = vpop.eup %2249 }
 0xd91   :  { %v1317_v39 = vpop.xlane.xlu2 %1316  ;;  %v1320_v40 = vmul.f32 %v2250_v38, %v2234_v9  ;;  %v2111_v38 = vld [vmem:[%s2885_s6 + $0x18] sm:$0xff] }
 0xd92   :  { %2251 = vrcp.f32 %v1317_v39  ;;  %1603 = vmatpush.bf16.msra.mxu3 %v2111_v38 }
 0xd93   :  { %2015 = vmatmul.msk.f32.vlgmr.msrb.gmra.mxu3 %vm360_vm11, %v1320_v40 }
 0xd98   :  { %v2252_v42 = vpop.eup %2251 }
 0xd99   :  { %v1321_v37 = vmul.f32 %v2252_v42, %v2236_v3  ;;  %v1420_v45 = vpop.permute.xlu2 %1419 }
 0xd9b   :  { %2016 = vmatmul.msk.f32.gmra.mxu3 %vm360_vm11, %v1321_v37  ;;  %v2110_v37 = vld [vmem:[%s2885_s6 + $0x10] sm:$0xff] }
 0xd9c   :  { %1604 = vmatpush.bf16.msra.mxu3 %v2110_v37 }
 0xda1   :  { %v1422_v43 = vpop.permute.xlu1 %1421 }
 0xda2   :  { %2021 = vmatpush.msk.msrb.mxu1 %vm395_vm1, %v1422_v43 }
 0xda4   :  { %1447 = vmatpush.msrb.mxu1 %v1420_v45 }
 0xdb6   :  { %v1411_v46 = vpop.xlane.xlu0 %1410 }
 0xdb7   :  { %2253 = vrcp.f32 %v1411_v46 }
 0xdbd   :  { %v2254_v47 = vpop.eup %2253 }
 0xdbe   :  { %v1417_v48 = vmul.f32 %v2254_v47, %v2238_v15  ;;  %v1414_v49 = vpop.xlane.xlu0 %1413 }
 0xdbf   :  { %2255 = vrcp.f32 %v1414_v49 }
 0xdc0   :  { %2022 = vmatmul.msk.f32.vlgmr.msrb.gmra.mxu1 %vm360_vm11, %v1417_v48 }
 0xdc5   :  { %v2256_v51 = vpop.eup %2255 }
 0xdc6   :  { %v1418_v41 = vmul.f32 %v2256_v51, %v2240_v17  ;;  %v1522_v17 = vperm.slane %v2674_v36, 3 }
 0xdc8   :  { %2023 = vmatmul.msk.f32.gmra.mxu1 %vm360_vm11, %v1418_v41 }
 0xdff   :  { %v1255_v52 = vpop.f32.mrf.mxu1 }
 0xe06   :  { %v1158_v53 = vpop.f32.mrf.mxu3 }
 0xe09   :  { %v1258_v54 = vpop.f32.mrf.mxu1 }
 0xe0a   :  { %v2152_v55 = vpack.i.bf16 %v1258_v54, %v1255_v52 }
 0xe0c   :  { %2153 = vrot.lane.b32.xlu0 %v2152_v55, %s2314_s22 }
 0xe0e   :  { %v1161_v56 = vpop.f32.mrf.mxu3 }
 0xe16   :  { %v1352_v60 = vpop.f32.mrf.mxu3 }
 0xe1e   :  { %v1355_v58 = vpop.f32.mrf.mxu3 }
 0xe1f   :  { %v2157_v62 = vpack.i.bf16 %v1355_v58, %v1352_v60 }
 0xe21   :  { %2158 = vrot.lane.b32.xlu2 %v2157_v62, %s2315_s23  ;;  %v1569_v62 = vperm.slane %v2674_v36, 4 }
 0xe3d   :  { %v1449_v1 = vpop.f32.mrf.mxu1 }
 0xe45   :  { %v1452_v2 = vpop.f32.mrf.mxu1 }
 0xe46   :  { %v2162_v20 = vpack.i.bf16 %v1452_v2, %v1449_v1 }
 0xe48   :  { %2163 = vrot.lane.b32.xlu1 %v2162_v20, %s2316_s24 }
 0xe7b   :  { %v2159_v8 = vpop.permute.xlu2 %2158 }
 0xe7c   :  { %v2161_v3 = vunpack.i.h.bf16 %v2159_v8  ;;  %v2160_v35 = vunpack.i.l.bf16 %v2159_v8 }
 0xe7e   :  { %v2154_v5 = vpop.permute.xlu0 %2153 }
 0xe7f   :  { %v2156_v57 = vunpack.i.h.bf16 %v2154_v5  ;;  %v2155_v63 = vunpack.i.l.bf16 %v2154_v5 }
 0xe81   :  { %v1480_v9 = vsel %vm328_vm13, %v1161_v56, %v2156_v57  ;;  %v1479_v10 = vsel %vm328_vm13, %v1158_v53, %v2155_v63 }
 0xe82   :  { %v1481_v6 = vsel %vm738_vm15, %v1479_v10, %v2160_v35  ;;  %v1482_v14 = vsel %vm738_vm15, %v1480_v9, %v2161_v3  ;;  %v1581_v10 = vperm.slane %v2674_v36, 6 }
 0xeba   :  { %v2164_v11 = vpop.permute.xlu1 %2163 }
 0xebb   :  { %v2166_v12 = vunpack.i.h.bf16 %v2164_v11  ;;  %v2165_v13 = vunpack.i.l.bf16 %v2164_v11 }
 0xebd   :  { %v1483_v32 = vsel %vm741_vm2, %v1481_v6, %v2165_v13  ;;  %v1484_v15 = vsel %vm741_vm2, %v1482_v14, %v2166_v12 }
 0xebe   :  { %v1485_v16 = vpack.c.bf16 %v1484_v15, %v1483_v32 }
 0xec0   :  { %2036 = vmatmul.msk.bf16.vlgmr.msra.gmra.mxu2 %vm228_vm4, %v1485_v16 }
 0xf43   :  { %v1515_v18 = vpop.f32.mrf.mxu2 }
 0xf44   :  { %v1520_v21 = vadd.f32 %v1515_v18, %v2648_v4 }
 0xf46   :  { %v2800_v61 = vadd.f32 %v1522_v17, %v1520_v21 }
 0xf48   :  { %v1525_v22 = vsel %vm228_vm4, %v2800_v61, 0.0 }
 0xf49   :  { %1526 = vadd.xlane.f32.xlu2 %v1525_v22 }
 0xf4b   :  { %v1517_v23 = vpop.f32.mrf.mxu2 }
 0xf4c   :  { %v1521_v25 = vadd.f32 %v1517_v23, %v2653_v7 }
 0xf4e   :  { %v2805_v59 = vadd.f32 %v1522_v17, %v1521_v25  ;;  %v2115_v17 = vld [vmem:[%s2886_s7 + $0x38] sm:$0xff]  ;;  %v2114_v25 = vld [vmem:[%s2886_s7 + $0x30] sm:$0xff] }
 0xf4f   :  { %1710 = vmatpush.bf16.msrb.mxu0 %v2115_v17 }
 0xf50   :  { %v1528_v27 = vsel %vm232_vm5, %v2805_v59, 0.0 }
 0xf51   :  { %1529 = vadd.xlane.f32.xlu1 %v1528_v27 }
 0xf53   :  { %1711 = vmatpush.bf16.msrb.mxu0 %v2114_v25 }
 0xfbc   :  { %v1527_v24 = vpop.xlane.xlu2 %1526 }
 0xfbd   :  { %v1531_v26 = vmul.f32 %v1527_v24, %v2437_v44 }
 0xfbf   :  { %v1533_v4 = vsub.f32 %v2800_v61, %v1531_v26  ;;  %v2113_v26 = vld [vmem:[%s2886_s7 + $0x28] sm:$0xff] }
 0xfc0   :  { %1712 = vmatpush.bf16.msrb.mxu0 %v2113_v26 }
 0xfc1   :  { %v1535_v28 = vmul.f32 %v1533_v4, %v1533_v4 }
 0xfc3   :  { %v1537_v29 = vsel %vm228_vm4, %v1535_v28, 0.0 }
 0xfc4   :  { %1538 = vadd.xlane.f32.xlu0 %v1537_v29  ;;  %v1530_v30 = vpop.xlane.xlu1 %1529 }
 0xfc5   :  { %v1532_v31 = vmul.f32 %v1530_v30, %v2437_v44 }
 0xfc7   :  { %v1534_v7 = vsub.f32 %v2805_v59, %v1532_v31 }
 0xfc9   :  { %v1536_v33 = vmul.f32 %v1534_v7, %v1534_v7 }
 0xfcb   :  { %v1540_v34 = vsel %vm232_vm5, %v1536_v33, 0.0 }
 0xfcc   :  { %1541 = vadd.xlane.f32.xlu2 %v1540_v34 }
0x1037   :  { %v1539_v39 = vpop.xlane.xlu0 %1538 }
0x1038   :  { %v1543_v40 = vmul.f32 %v1539_v39, %v2437_v44 }
0x103a   :  { %v1545_v42 = vadd.f32 1e-05, %v1543_v40 }
0x103c   :  { %2257 = vrsqrt.f32 %v1545_v42  ;;  %vm1553_vm11 = vweird.f32 %v1545_v42 }
0x103f   :  { %v1542_v43 = vpop.xlane.xlu2 %1541 }
0x1040   :  { %v1544_v45 = vmul.f32 %v1542_v43, %v2437_v44 }
0x1042   :  { %v2258_v46 = vpop.eup %2257  ;;  %v1546_v47 = vadd.f32 1e-05, %v1544_v45 }
0x1043   :  { %v1548_v48 = vmul.f32 %v2258_v46, %v1545_v42  ;;  %vm1554_vm13 = vweird.f32 %v2258_v46 }
0x1044   :  { %2259 = vrsqrt.f32 %v1546_v47  ;;  %vm1555_vm14 = vmor %vm1553_vm11, %vm1554_vm13  ;;  %vm1563_vm15 = vweird.f32 %v1546_v47  ;;  %vm1793_vm13 = vcmask 1042432  }
0x1045   :  { %v1549_v49 = vmul.f32 %v2258_v46, %v1548_v48 }
0x1047   :  { %v1550_v51 = vmul.f32 0.5, %v1549_v49 }
0x1049   :  { %v1551_v41 = vsub.f32 1.5, %v1550_v51 }
0x104a   :  { %v2260_v52 = vpop.eup %2259 }
0x104b   :  { %v1552_v53 = vmul.f32 %v2258_v46, %v1551_v41  ;;  %v1558_v54 = vmul.f32 %v2260_v52, %v1546_v47  ;;  %vm1564_vm1 = vweird.f32 %v2260_v52 }
0x104c   :  { %vm1565_vm2 = vmor %vm1563_vm15, %vm1564_vm1 }
0x104d   :  { %v1559_v55 = vmul.f32 %v2260_v52, %v1558_v54  ;;  %v1556_v56 = vsel %vm1555_vm14, %v2258_v46, %v1552_v53  ;;  %vm2891_vm14 = vcmask 1040384  }
0x104e   :  { %v1567_v1 = vmul.f32 %v1556_v56, %v1533_v4 }
0x104f   :  { %v1560_v60 = vmul.f32 0.5, %v1559_v55 }
0x1050   :  { %v1570_v0 = vmul.f32 %v1569_v62, %v1567_v1 }
0x1051   :  { %v1561_v58 = vsub.f32 1.5, %v1560_v60 }
0x1052   :  { %v1573_v63 = vadd.f32 %v1572_v19, %v1570_v0 }
0x1053   :  { %v1562_v2 = vmul.f32 %v2260_v52, %v1561_v58 }
0x1055   :  { %v1566_v20 = vsel %vm1565_vm2, %v2260_v52, %v1562_v2 }
0x1056   :  { %v1568_v5 = vmul.f32 %v1566_v20, %v1534_v7  ;;  %v2112_v7 = vld [vmem:[%s2886_s7 + $0x20] sm:$0xff] }
0x1057   :  { %1713 = vmatpush.bf16.msrb.mxu0 %v2112_v7 }
0x1058   :  { %v1571_v57 = vmul.f32 %v1569_v62, %v1568_v5 }
0x105a   :  { %v1574_v8 = vadd.f32 %v1572_v19, %v1571_v57 }
0x105c   :  { %v1575_v9 = vpack.c.bf16 %v1574_v8, %v1573_v63 }
0x105e   :  { %2049 = vmatmul.msk.bf16.vlgmr.msra.gmra.mxu3 %vm228_vm4, %v1575_v9 }
0x10e1   :  { %v1606_v3 = vpop.f32.mrf.mxu3 }
0x10e2   :  { %v2827_v35 = vadd.f32 %v1606_v3, %v1581_v10 }
0x10e4   :  { %v1613_v11 = vmul.f32 0.70710677, %v2827_v35  ;;  %v1611_v3 = vmul.f32 0.5, %v2827_v35 }
0x10e6   :  { %v1619_v12 = vand.u32 2147483647, %v1613_v11  ;;  %vm1615_vm3 = vcmp.lt.f32.partialorder %v1613_v11, 0.0 }
0x10e7   :  { %v1617_v0 = vsel %vm1615_vm3, -1.0, %v2317_v50 }
0x10e8   :  { %v1621_v13 = vmul.f32 0.3275911, %v1619_v12  ;;  %v1651_v4 = vsub.f32 0.0, %v1619_v12 }
0x10e9   :  { %v1608_v6 = vpop.f32.mrf.mxu3 }
0x10ea   :  { %v1623_v14 = vadd.f32 1.0, %v1621_v13  ;;  %v1609_v32 = vadd.f32 %v1608_v6, %v1581_v10  ;;  %v1653_v33 = vmul.f32 %v1651_v4, %v1619_v12 }
0x10ec   :  { %2261 = vrcp.f32 %v1623_v14  ;;  %v1614_v15 = vmul.f32 0.70710677, %v1609_v32  ;;  %v1655_v42 = vmul.f32 1.442695, %v1653_v33  ;;  %v1612_v12 = vmul.f32 0.5, %v1609_v32 }
0x10ee   :  { %v1620_v16 = vand.u32 2147483647, %v1614_v15  ;;  %vm1616_vm6 = vcmp.lt.f32.partialorder %v1614_v15, 0.0 }
0x10ef   :  { %v1618_v8 = vsel %vm1616_vm6, -1.0, %v2317_v50 }
0x10f0   :  { %v1622_v18 = vmul.f32 0.3275911, %v1620_v16  ;;  %v1652_v37 = vsub.f32 0.0, %v1620_v16 }
0x10f2   :  { %v2262_v21 = vpop.eup %2261  ;;  %v1624_v22 = vadd.f32 1.0, %v1622_v18  ;;  %v1654_v48 = vmul.f32 %v1652_v37, %v1620_v16  ;;  %v1722_v16 = vperm.slane %v2674_v36, 7 }
0x10f3   :  { %v1627_v23 = vmul.f32 %v2262_v21, %v1623_v14 }
0x10f4   :  { %2263 = vrcp.f32 %v1624_v22  ;;  %v1657_v53 = vmul.f32 1.442695, %v1654_v48  ;;  %v2168_v48 = vld [vmem:[%s2881_s2 + $0x7] ss:$0 sm:$0xff] }
0x10f5   :  { %v1629_v27 = vsub.f32 2.0, %v1627_v23  ;;  %2265 = vpow2.f32 %v1655_v42  ;;  %v2116_v42 = vld [vmem:[%s2887_s8] sm:$0xff] }
0x10f6   :  { %2267 = vpow2.f32 %v1657_v53 }
0x10f7   :  { %v1631_v24 = vmul.f32 %v2262_v21, %v1629_v27 }
0x10f9   :  { %v1633_v28 = vmul.f32 1.0614054, %v1631_v24 }
0x10fa   :  { %v2264_v29 = vpop.eup %2263 }
0x10fb   :  { %v1635_v30 = vadd.f32 -1.4531521, %v1633_v28  ;;  %v1628_v31 = vmul.f32 %v2264_v29, %v1624_v22  ;;  %v2266_v56 = vpop.eup %2265 }
0x10fc   :  { %v2268_v19 = vpop.eup %2267 }
0x10fd   :  { %v1637_v34 = vmul.f32 %v1635_v30, %v1631_v24  ;;  %v1630_v38 = vsub.f32 2.0, %v1628_v31 }
0x10ff   :  { %v1639_v39 = vadd.f32 1.4214138, %v1637_v34  ;;  %v1632_v40 = vmul.f32 %v2264_v29, %v1630_v38 }
0x1101   :  { %v1641_v43 = vmul.f32 %v1639_v39, %v1631_v24  ;;  %v1634_v45 = vmul.f32 1.0614054, %v1632_v40  ;;  %v2117_v39 = vld [vmem:[%s2887_s8 + $0x8] sm:$0xff] }
0x1102   :  { %1837 = vmatpush.bf16.msra.mxu1 %v2117_v39 }
0x1103   :  { %v1643_v46 = vadd.f32 -0.28449672, %v1641_v43  ;;  %v1636_v47 = vadd.f32 -1.4531521, %v1634_v45 }
0x1105   :  { %v1645_v49 = vmul.f32 %v1643_v46, %v1631_v24  ;;  %v1638_v51 = vmul.f32 %v1636_v47, %v1632_v40 }
0x1106   :  { %1838 = vmatpush.bf16.msra.mxu1 %v2116_v42 }
0x1107   :  { %v1647_v41 = vadd.f32 0.2548296, %v1645_v49  ;;  %v1640_v52 = vadd.f32 1.4214138, %v1638_v51 }
0x1109   :  { %v1649_v54 = vmul.f32 %v1647_v41, %v1631_v24  ;;  %v1642_v55 = vmul.f32 %v1640_v52, %v1632_v40  ;;  %v2169_v41 = vld [vmem:[%s2881_s2 + $0x8] ss:$0 sm:$0xff] }
0x110b   :  { %v1659_v60 = vmul.f32 %v2266_v56, %v1649_v54  ;;  %v1644_v58 = vadd.f32 -0.28449672, %v1642_v55  ;;  %v2318_v55 = vmov 5.0  }
0x110d   :  { %v1646_v62 = vmul.f32 %v1644_v58, %v1632_v40  ;;  %v1661_v1 = vsub.f32 1.0, %v1659_v60 }
0x110f   :  { %v1648_v2 = vadd.f32 0.2548296, %v1646_v62  ;;  %v1663_v5 = vmul.f32 %v1661_v1, %v1617_v0 }
0x1111   :  { %v1650_v20 = vmul.f32 %v1648_v2, %v1632_v40  ;;  %v1665_v9 = vadd.f32 1.0, %v1663_v5 }
0x1113   :  { %v1660_v57 = vmul.f32 %v2268_v19, %v1650_v20  ;;  %v1667_v6 = vmul.f32 %v1665_v9, %v1611_v3 }
0x1115   :  { %v1662_v63 = vsub.f32 1.0, %v1660_v57 }
0x1117   :  { %v1664_v10 = vmul.f32 %v1662_v63, %v1618_v8 }
0x1119   :  { %v1666_v13 = vadd.f32 1.0, %v1664_v10 }
0x111b   :  { %v1668_v11 = vmul.f32 %v1666_v13, %v1612_v12 }
0x111d   :  { %v1669_v14 = vpack.c.bf16 %v1668_v11, %v1667_v6 }
0x111f   :  { %2074 = vmatmul.msk.bf16.vlgmr.msrb.gmra.mxu0 %vm143_vm0, %v1669_v14 }
0x119c   :  { %v1715_v17 = vpop.f32.mrf.mxu0 }
0x119d   :  { %v1720_v15 = vadd.f32 %v1715_v17, %v2800_v61 }
0x119f   :  { %v1723_v18 = vadd.f32 %v1722_v16, %v1720_v15 }
0x11a1   :  { %v1725_v21 = vsel %vm228_vm4, %v1723_v18, 0.0 }
0x11a2   :  { %1726 = vadd.xlane.f32.xlu1 %v1725_v21 }
0x11a4   :  { %v1717_v50 = vpop.f32.mrf.mxu0 }
0x11a5   :  { %v1721_v22 = vadd.f32 %v1717_v50, %v2805_v59 }
0x11a7   :  { %v1724_v35 = vadd.f32 %v1722_v16, %v1721_v22 }
0x11a9   :  { %v1728_v32 = vsel %vm232_vm5, %v1724_v35, 0.0 }
0x11aa   :  { %1729 = vadd.xlane.f32.xlu0 %v1728_v32 }
0x1215   :  { %v1727_v23 = vpop.xlane.xlu1 %1726 }
0x1216   :  { %v1731_v25 = vmul.f32 %v1727_v23, %v2437_v44 }
0x1218   :  { %v1733_v27 = vsub.f32 %v1723_v18, %v1731_v25 }
0x121a   :  { %v1735_v24 = vmul.f32 %v1733_v27, %v1733_v27 }
0x121c   :  { %v1737_v36 = vsel %vm228_vm4, %v1735_v24, 0.0 }
0x121d   :  { %1738 = vadd.xlane.f32.xlu2 %v1737_v36  ;;  %v1730_v61 = vpop.xlane.xlu0 %1729  ;;  %v2170_v36 = vld [vmem:[%s2888_s9] ss:$0 sm:$0xff] }
0x121e   :  { %v1732_v26 = vmul.f32 %v1730_v61, %v2437_v44 }
0x1220   :  { %v1734_v4 = vsub.f32 %v1724_v35, %v1732_v26 }
0x1222   :  { %v1736_v28 = vmul.f32 %v1734_v4, %v1734_v4 }
0x1224   :  { %v1740_v29 = vsel %vm232_vm5, %v1736_v28, 0.0 }
0x1225   :  { %1741 = vadd.xlane.f32.xlu1 %v1740_v29 }
0x1290   :  { %v1739_v59 = vpop.xlane.xlu2 %1738 }
0x1291   :  { %v1743_v30 = vmul.f32 %v1739_v59, %v2437_v44 }
0x1293   :  { %v1745_v31 = vadd.f32 1e-05, %v1743_v30 }
0x1295   :  { %2269 = vrsqrt.f32 %v1745_v31  ;;  %vm1753_vm5 = vweird.f32 %v1745_v31 }
0x1298   :  { %v1742_v7 = vpop.xlane.xlu1 %1741 }
0x1299   :  { %v1744_v33 = vmul.f32 %v1742_v7, %v2437_v44 }
0x129b   :  { %v2270_v34 = vpop.eup %2269  ;;  %v1746_v38 = vadd.f32 1e-05, %v1744_v33 }
0x129c   :  { %v1748_v40 = vmul.f32 %v2270_v34, %v1745_v31  ;;  %vm1754_vm0 = vweird.f32 %v2270_v34 }
0x129d   :  { %2271 = vrsqrt.f32 %v1746_v38  ;;  %vm1755_vm7 = vmor %vm1753_vm5, %vm1754_vm0  ;;  %vm1763_vm10 = vweird.f32 %v1746_v38 }
0x129e   :  { %v1749_v37 = vmul.f32 %v2270_v34, %v1748_v40  ;;  %2273 = vrcp.f32 %v2318_v55 }
0x12a0   :  { %v1750_v43 = vmul.f32 0.5, %v1749_v37 }
0x12a2   :  { %v1751_v45 = vsub.f32 1.5, %v1750_v43 }
0x12a3   :  { %v2272_v46 = vpop.eup %2271 }
0x12a4   :  { %v1752_v44 = vmul.f32 %v2270_v34, %v1751_v45  ;;  %v1758_v47 = vmul.f32 %v2272_v46, %v1746_v38  ;;  %vm1764_vm9 = vweird.f32 %v2272_v46  ;;  %v2274_v20 = vpop.eup %2273 }
0x12a5   :  { %vm1765_vm12 = vmor %vm1763_vm10, %vm1764_vm9  ;;  %v1784_v57 = vmul.f32 5.0, %v2274_v20  ;;  %vm1788_vm11 = vweird.f32 %v2274_v20 }
0x12a6   :  { %v1756_v49 = vsel %vm1755_vm7, %v2270_v34, %v1752_v44  ;;  %v1759_v51 = vmul.f32 %v2272_v46, %v1758_v47 }
0x12a7   :  { %v1767_v52 = vmul.f32 %v1756_v49, %v1733_v27  ;;  %v1785_v3 = vsub.f32 1.0, %v1784_v57 }
0x12a8   :  { %v1760_v53 = vmul.f32 0.5, %v1759_v51 }
0x12a9   :  { %v1770_v54 = vmul.f32 %v2168_v48, %v1767_v52  ;;  %v1786_v14 = vmul.f32 %v2274_v20, %v1785_v3 }
0x12aa   :  { %v1761_v56 = vsub.f32 1.5, %v1760_v53 }
0x12ab   :  { %v1773_v60 = vadd.f32 %v2169_v41, %v1770_v54  ;;  %v1787_v18 = vadd.f32 %v2274_v20, %v1786_v14 }
0x12ac   :  { %v1762_v58 = vmul.f32 %v2272_v46, %v1761_v56 }
0x12ad   :  { %v1776_v62 = vsel %vm1775_vm8, %v1773_v60, 0.0  ;;  %v1794_v9 = vrot.slane %v1773_v60, 5  ;;  %v1789_v35 = vsel %vm1788_vm11, %v2274_v20, %v1787_v18 }
0x12ae   :  { %v1777_v1 = vrot.slane %v1776_v62, 4  ;;  %v1766_v2 = vsel %vm1765_vm12, %v2272_v46, %v1762_v58 }
0x12af   :  { %v1768_v19 = vmul.f32 %v1766_v2, %v1734_v4 }
0x12b0   :  { %v1778_v0 = vadd.f32 %v1777_v1, %v1776_v62 }
0x12b1   :  { %v1771_v5 = vmul.f32 %v2168_v48, %v1768_v19 }
0x12b2   :  { %v1779_v8 = vrot.slane %v1778_v0, 2 }
0x12b3   :  { %v1774_v63 = vadd.f32 %v2169_v41, %v1771_v5 }
0x12b4   :  { %v1780_v6 = vadd.f32 %v1779_v8, %v1778_v0 }
0x12b5   :  { %v1795_v10 = vrot.slane %v1774_v63, 5 }
0x12b6   :  { %v1781_v17 = vrot.slane %v1780_v6, 1 }
0x12b7   :  { %v1796_v12 = vsel %vm1793_vm13, %v1794_v9, %v1795_v10 }
0x12b8   :  { %v1798_v13 = vsel %vm1775_vm8, %v1796_v12, 0.0  ;;  %v1782_v50 = vadd.f32 %v1781_v17, %v1780_v6 }
0x12b9   :  { %v1799_v11 = vrot.slane %v1798_v13, 4 }
0x12ba   :  { %v1790_v23 = vmul.f32 %v1789_v35, %v1782_v50 }
0x12bb   :  { %v1800_v16 = vadd.f32 %v1799_v11, %v1798_v13 }
0x12bd   :  { %v1801_v15 = vrot.slane %v1800_v16, 2 }
0x12bf   :  { %v1802_v21 = vadd.f32 %v1801_v15, %v1800_v16 }
0x12c1   :  { %v1803_v22 = vrot.slane %v1802_v21, 1 }
0x12c3   :  { %v1804_v32 = vadd.f32 %v1803_v22, %v1802_v21 }
0x12c5   :  { %v1805_v25 = vmul.f32 %v1804_v32, %v1789_v35 }
0x12c7   :  { %v1806_v27 = vsel %vm2891_vm14, %v1790_v23, %v1805_v25 }
0x12c8   :  { %v1807_v24 = vpack.c.bf16 %v1806_v27, %v1806_v27 }
0x12ca   :  { %2083 = vmatmul.msk.bf16.vlgmr.msra.gmra.mxu1 %vm228_vm4, %v1807_v24 }
0x1347   :  { %v1840_v61 = vpop.f32.mrf.mxu1 }
0x1348   :  { %v1841_v26 = vadd.f32 %v2170_v36, %v1840_v61 }
0x134a   :  { %1844 = vst [vmem:[#allocation2] sm:$0x3] %v1841_v26 }
0x134b   :  { %1855 = dma.vmem_to_hbm [thread:$0]  %s1851_s4, 32, %s1853_s11, [#allocation3]  }
0x134f   :  { %v1842_v4 = vpop.f32.mrf.mxu1 }
0x1350   :  { %2299 = dma.done.wait [#allocation3], 32  }
0x1351   :  { %2300 = vsyncadd [#allocation3], 4294967264 }
0x1352   :  { %1860 = vsyncpa [#allocation3], 1 }

</bundles_post_ra>
